<compile_context>
chip_gen: v6e
topology: v6e:2x2x1
jax: 0.10.0
libtpu: 0.0.40
codegen_flags: <defaults>
</compile_context>

<pallas_src>
import math

import numpy as np
import jax
import jax.numpy as jnp
from jax.experimental import pallas as pl
from jax.experimental.pallas import tpu as pltpu


# ----------------------------------------------------------------------------
# Synthetic config (mirrors cfg.* fields used by the PyTorch module)
# ----------------------------------------------------------------------------
class _Ns:
    pass


cfg = _Ns()
cfg.FPN = _Ns()
cfg.RPN = _Ns()
cfg.PREPROC = _Ns()

cfg.FPN.NUM_CHANNEL = 32
cfg.FPN.ANCHOR_STRIDES = (4, 8)                 # two FPN levels (small test)
cfg.RPN.ANCHOR_RATIOS = (0.5, 1.0, 2.0)         # num_anchors = 3
cfg.RPN.ANCHOR_SIZES = (16, 32)                 # one scale per level
cfg.PREPROC.TEST_LONG_EDGE_SIZE = 64
cfg.PREPROC.MAX_SIZE = 64
cfg.RPN.TEST_PRE_NMS_TOPK = 64
cfg.RPN.TEST_POST_NMS_TOPK = 32
cfg.RPN.PROPOSAL_NMS_THRESH = 0.7

NUM_ANCHORS = len(cfg.RPN.ANCHOR_RATIOS)        # A = 3
NUM_HEAD = 5 * NUM_ANCHORS                      # 15 real head outputs (A cls + 4A box)
HEAD_OUT = 128                                  # padded to full lane width (dense vst)

# ---- static tiling geometry (derived once from the config) ------------------
BACKBONE_SHAPES = [(int(math.ceil(cfg.PREPROC.TEST_LONG_EDGE_SIZE / s)),
                    int(math.ceil(cfg.PREPROC.TEST_LONG_EDGE_SIZE / s)))
                   for s in cfg.FPN.ANCHOR_STRIDES]        # [(16,16), (8,8)]
TH = 8                                                      # output rows per tile
WP = max(w for (_, w) in BACKBONE_SHAPES) + 2               # common padded width = 18
P_OUT = TH * WP                                             # 144 conv/head rows per tile
_P_IN_MIN = 2 * WP + 2 + P_OUT                              # last shifted slice must fit
P_IN_PAD = ((_P_IN_MIN + 15) // 16) * 16                    # 192 flat input rows per tile


# ----------------------------------------------------------------------------
# Anchor generation (static numpy, exact copy of the PyTorch module's logic)
# ----------------------------------------------------------------------------
def generate_anchors_keras(scales, ratios, shape, feature_stride, anchor_stride):
    scales, ratios = np.meshgrid(np.array(scales), np.array(ratios))
    scales = scales.flatten()
    ratios = ratios.flatten()
    size_ratios = feature_stride * feature_stride / ratios
    widths = np.round(np.sqrt(size_ratios))
    heights = np.round(widths * ratios)
    widths = widths * (scales / feature_stride)
    heights = heights * (scales / feature_stride)
    shifts_y = np.arange(0, shape[0], anchor_stride) * feature_stride + (feature_stride - 1) / 2
    shifts_x = np.arange(0, shape[1], anchor_stride) * feature_stride + (feature_stride - 1) / 2
    shifts_x, shifts_y = np.meshgrid(shifts_x, shifts_y)
    box_widths, box_centers_x = np.meshgrid(widths, shifts_x)
    box_heights, box_centers_y = np.meshgrid(heights, shifts_y)
    box_centers = np.stack([box_centers_y, box_centers_x], axis=2).reshape([-1, 2])
    box_sizes = np.stack([box_heights, box_widths], axis=2).reshape([-1, 2])
    boxes = np.concatenate([box_centers - 0.5 * (box_sizes - 1),
                            box_centers + 0.5 * (box_sizes - 1)], axis=1)
    boxes[:, [2, 3]] += 1
    boxes = boxes[:, [1, 0, 3, 2]].astype(np.float32)
    return boxes


def generate_pyramid_anchors(scales, ratios, feature_shapes, feature_strides, anchor_stride):
    anchors = []
    for i in range(len(scales)):
        anchors.append(generate_anchors_keras(scales[i], ratios, feature_shapes[i],
                                              feature_strides[i], anchor_stride))
    return anchors


def precompute_anchors():
    all_anchors_fpn = generate_pyramid_anchors(
        scales=tuple(cfg.RPN.ANCHOR_SIZES), ratios=tuple(cfg.RPN.ANCHOR_RATIOS),
        feature_shapes=np.array(BACKBONE_SHAPES), feature_strides=tuple(cfg.FPN.ANCHOR_STRIDES),
        anchor_stride=1)
    return jnp.asarray(np.concatenate(all_anchors_fpn, axis=0))     # (A_tot, 4)


# ----------------------------------------------------------------------------
# Pallas kernel: in-kernel 3x3 conv (9 shift-accumulated matmuls, one f32 acc)
#                + bias + ReLU + fused 1x1 class/box heads, lane-dense output
# ----------------------------------------------------------------------------
def rpn_conv_head_kernel(x_ref, w0_ref, b0_ref, wh_ref, bh_ref, out_ref):
    C = cfg.FPN.NUM_CHANNEL
    # x_ref block: (1, P_IN_PAD, C) bf16 -- one halo row-tile, flattened (h, w)-major
    # with row stride WP.  Widen to f32 once so the 9 unaligned halo shifts are
    # plain unpacked sublane relayouts (bf16 -> f32 is exact); the MXU operands
    # are cast back to bf16 per tap, so MXU passes / accumulate stay as before.
    x = x_ref[0].astype(jnp.float32)                               # (P_IN_PAD, C)

    # 3x3 conv as 9 shift-accumulated matmuls into ONE running f32 accumulator
    # (maps onto the v7x MRB in-place accumulate; correct formulation on v5e/v6e).
    acc = jnp.zeros((P_OUT, C), jnp.float32)
    for k in range(9):
        off = (k // 3) * WP + (k % 3)                              # dy*WP + dx
        tap = x[off:off + P_OUT, :].astype(jnp.bfloat16)           # (P_OUT, C)
        acc = acc + jnp.dot(tap, w0_ref[k], preferred_element_type=jnp.float32)

    hidden = jnp.maximum(acc + b0_ref[...], 0.0)                   # f32 epilogue

    # Fused head matmul: cols [0:A) class logits, [A:5A) box logits, rest zeros.
    # HEAD_OUT = 128 -> one unmasked, lane-dense (P_OUT, 128) store per tile.
    out_ref[0] = (jnp.dot(hidden.astype(jnp.bfloat16), wh_ref[...],
                          preferred_element_type=jnp.float32) + bh_ref[...])


def prep_params(params):
    """One-time weight layout prep (transposes / head fusion / dtype casts)."""
    C = cfg.FPN.NUM_CHANNEL
    A = NUM_ANCHORS
    # PyTorch conv weight (out, in, 3, 3) -> (9, in, out) tap matrices, bf16
    w0 = jnp.transpose(params["w0"], (2, 3, 1, 0)).reshape(9, C, C).astype(jnp.bfloat16)
    b0 = params["b0"].reshape(1, C).astype(jnp.float32)
    wc = jnp.transpose(params["wc"][:, :, 0, 0], (1, 0))              # (C, A)
    wb = jnp.transpose(params["wb"][:, :, 0, 0], (1, 0))              # (C, 4A)
    wh = (jnp.zeros((C, HEAD_OUT), jnp.float32)
          .at[:, :A].set(wc)
          .at[:, A:NUM_HEAD].set(wb)).astype(jnp.bfloat16)            # (C, 128)
    bh = (jnp.zeros((1, HEAD_OUT), jnp.float32)
          .at[:, :A].set(params["bc"].reshape(1, A))
          .at[:, A:NUM_HEAD].set(params["bb"].reshape(1, 4 * A)))     # (1, 128)
    return {"w0": w0, "b0": b0, "wh": wh, "bh": bh}


def build_tiles(features):
    """Cast each NCHW feature to bf16, SamePad it, and cut it into fixed-size
    halo row-tiles (TH+2 padded rows x WP padded cols), flattened (row-major,
    stride WP) and stacked over all levels.  Only the 2 halo rows per tile are
    duplicated -- no 9x im2col blow-up."""
    C = cfg.FPN.NUM_CHANNEL
    tiles, meta = [], []
    for f in features:
        _, _, H, W = f.shape
        h_pad = -(-H // TH) * TH                                      # round H up to TH
        # bf16 FIRST, then pad: halves all wrapper-side bytes feeding the kernel.
        x = jnp.transpose(f[0], (1, 2, 0)).astype(jnp.bfloat16)       # (H, W, C)
        xp = jnp.pad(x, ((1, 1 + h_pad - H), (1, WP - W - 1), (0, 0)))  # (h_pad+2, WP, C)
        nt = h_pad // TH
        for t in range(nt):
            win = xp[t * TH: t * TH + TH + 2]                         # (TH+2, WP, C) halo tile
            flat = win.reshape((TH + 2) * WP, C)
            flat = jnp.pad(flat, ((0, P_IN_PAD - (TH + 2) * WP), (0, 0)))
            tiles.append(flat)
        meta.append((nt, H, W))
    return jnp.stack(tiles, axis=0), meta                             # (T, P_IN_PAD, C) bf16


def rpn_head_tiles(tiles, prepped):
    """Single pallas_call over the stacked halo tiles of all FPN levels."""
    T = tiles.shape[0]
    C = cfg.FPN.NUM_CHANNEL
    flops = 2 * T * P_OUT * (9 * C * C + C * HEAD_OUT)
    bytes_accessed = (T * P_IN_PAD * C * 2                 # bf16 input tiles
                      + 9 * C * C * 2 + C * HEAD_OUT * 2   # bf16 weights
                      + C * 4 + HEAD_OUT * 4               # f32 biases
                      + T * P_OUT * HEAD_OUT * 4)          # f32 output
    return pl.pallas_call(
        rpn_conv_head_kernel,
        out_shape=jax.ShapeDtypeStruct((T, P_OUT, HEAD_OUT), jnp.float32),
        grid=(T,),
        in_specs=[
            pl.BlockSpec((1, P_IN_PAD, C), lambda t: (t, 0, 0)),
            pl.BlockSpec((9, C, C), lambda t: (0, 0, 0)),
            pl.BlockSpec((1, C), lambda t: (0, 0)),
            pl.BlockSpec((C, HEAD_OUT), lambda t: (0, 0)),
            pl.BlockSpec((1, HEAD_OUT), lambda t: (0, 0)),
        ],
        out_specs=pl.BlockSpec((1, P_OUT, HEAD_OUT), lambda t: (t, 0, 0)),
        # Tiles are independent -> "parallel" lets Mosaic shard the tile axis
        # across v7x's two TensorCores (no-op on single-TC v5e/v6e).
        # Per-tile VMEM use is <1 MiB here; at production sizes raise
        # vmem_limit_bytes in these CompilerParams to fit bigger row tiles.
        compiler_params=pltpu.CompilerParams(dimension_semantics=("parallel",)),
        cost_estimate=pl.CostEstimate(flops=flops, transcendentals=0,
                                      bytes_accessed=bytes_accessed),
    )(tiles, prepped["w0"], prepped["b0"], prepped["wh"], prepped["bh"])


# ----------------------------------------------------------------------------
# decode_bbox_target + clip_boxes (plain JAX; one vreg of elementwise work)
# ----------------------------------------------------------------------------
def decode_and_clip(deltas, anchors, img_shape):
    """deltas/anchors: (N, 4).  Returns decoded, clipped boxes (N, 4)."""
    clip_val = float(np.log(cfg.PREPROC.MAX_SIZE / 16.0))
    tx, ty, tw, th = deltas[:, 0], deltas[:, 1], deltas[:, 2], deltas[:, 3]
    ax1, ay1, ax2, ay2 = anchors[:, 0], anchors[:, 1], anchors[:, 2], anchors[:, 3]
    # reference decode_bbox_target: width/height without +1
    wa = ax2 - ax1
    ha = ay2 - ay1
    xa = (ax2 + ax1) * 0.5
    ya = (ay2 + ay1) * 0.5
    wb = jnp.exp(jnp.minimum(tw, clip_val)) * wa
    hb = jnp.exp(jnp.minimum(th, clip_val)) * ha
    xb = tx * wa + xa
    yb = ty * ha + ya
    x1 = xb - wb * 0.5
    y1 = yb - hb * 0.5
    x2 = xb + wb * 0.5
    y2 = yb + hb * 0.5
    # reference clip_boxes with window = image.shape[2:] = (H, W):
    # cols 0,2 (x) clamp to window[0]=H, cols 1,3 (y) clamp to window[1]=W.
    win0, win1 = float(img_shape[0]), float(img_shape[1])
    x1 = jnp.clip(x1, 0.0, win0)
    x2 = jnp.clip(x2, 0.0, win0)
    y1 = jnp.clip(y1, 0.0, win1)
    y2 = jnp.clip(y2, 0.0, win1)
    return jnp.stack([x1, y1, x2, y2], axis=1)


# ----------------------------------------------------------------------------
# NMS + proposal padding (vectorized IoU; statically-unrolled greedy suppression)
# ----------------------------------------------------------------------------
# TODO(synk): torchvision ops.nms's sequential data-dependent suppression has no
# clean batched Pallas equivalent; the IoU/suppress matrix is fully vectorized
# and the 64-step greedy pass is statically unrolled (a Pallas SMEM-scalar-loop
# variant is the alternative if the unrolled XLA graph ever becomes the issue).
def greedy_nms_keep(boxes, thresh):
    N = boxes.shape[0]
    x1, y1, x2, y2 = boxes[:, 0], boxes[:, 1], boxes[:, 2], boxes[:, 3]
    areas = (x2 - x1) * (y2 - y1)
    xx1 = jnp.maximum(x1[:, None], x1[None, :])
    yy1 = jnp.maximum(y1[:, None], y1[None, :])
    xx2 = jnp.minimum(x2[:, None], x2[None, :])
    yy2 = jnp.minimum(y2[:, None], y2[None, :])
    inter = jnp.maximum(xx2 - xx1, 0.0) * jnp.maximum(yy2 - yy1, 0.0)
    union = areas[:, None] + areas[None, :] - inter
    iou = inter / jnp.maximum(union, 1e-8)          # eps guards degenerate boxes
    idxs = jnp.arange(N)
    # suppress_mat[i, j]: box j would be suppressed by box i (higher score)
    suppress_mat = (iou > thresh) & (idxs[None, :] > idxs[:, None])

    keep = jnp.ones((N,), dtype=jnp.bool_)
    for i in range(N):                              # static unroll (N = 64)
        keep = keep & ~(suppress_mat[i] & keep[i])
    return keep


def nms_and_pad(boxes, post_nms_topk, thresh):
    keep = greedy_nms_keep(boxes, thresh)
    ranks = jnp.cumsum(keep.astype(jnp.int32)) - 1
    valid = keep & (ranks < post_nms_topk)
    dest = jnp.where(valid, ranks, post_nms_topk)          # dump invalid in spare row
    out = jnp.zeros((post_nms_topk + 1, 4), jnp.float32).at[dest].set(boxes)
    return out[:post_nms_topk]


# ----------------------------------------------------------------------------
# RPN forward
# ----------------------------------------------------------------------------
def rpn_forward(image, features, prepped, all_anchors):
    A = NUM_ANCHORS
    # One kernel launch over the stacked halo row-tiles of all FPN levels.
    tiles, meta = build_tiles(features)
    out = rpn_head_tiles(tiles, prepped)                              # (T, P_OUT, 128)
    out = out.reshape(-1, TH, WP, HEAD_OUT)                           # (T, TH, WP, 128)

    # Per-level: stitch tiles back, drop halo/padding columns & rows, keep the
    # 15 real head columns.  Row order is the reference (h, w) NHWC flatten.
    heads, t0 = [], 0
    for (nt, H, W) in meta:
        lvl = out[t0:t0 + nt].reshape(nt * TH, WP, HEAD_OUT)[:H, :W, :NUM_HEAD]
        heads.append(lvl.reshape(H * W, NUM_HEAD))
        t0 += nt
    head = jnp.concatenate(heads, axis=0)                             # (A_tot/A, 15)

    scores = head[:, :A].reshape(-1)                                  # (A_tot,)
    boxes_logits = head[:, A:NUM_HEAD].reshape(-1, 4)                 # (A_tot, 4)

    image_shape2d = image.shape[2:]
    topk = min(cfg.RPN.TEST_PRE_NMS_TOPK, all_anchors.shape[0])
    topk_scores, order = jax.lax.top_k(scores, topk)
    deltas = boxes_logits[order, :]
    pre_nms_anchors = all_anchors[order, :]

    boxes = decode_and_clip(deltas, pre_nms_anchors, image_shape2d)
    proposals = nms_and_pad(boxes, cfg.RPN.TEST_POST_NMS_TOPK,
                            cfg.RPN.PROPOSAL_NMS_THRESH)
    return proposals


rpn_forward_jit = jax.jit(rpn_forward)


# ----------------------------------------------------------------------------
# Deterministic parameter init + example run
# ----------------------------------------------------------------------------
def init_params(key):
    C = cfg.FPN.NUM_CHANNEL
    A = NUM_ANCHORS
    k = jax.random.split(key, 6)
    return {
        "w0": 0.05 * jax.random.normal(k[0], (C, C, 3, 3), jnp.float32),
        "b0": 0.05 * jax.random.normal(k[1], (C,), jnp.float32),
        "wc": 0.05 * jax.random.normal(k[2], (A, C, 1, 1), jnp.float32),
        "bc": 0.05 * jax.random.normal(k[3], (A,), jnp.float32),
        "wb": 0.05 * jax.random.normal(k[4], (4 * A, C, 1, 1), jnp.float32),
        "bb": 0.05 * jax.random.normal(k[5], (4 * A,), jnp.float32),
    }


if __name__ == "__main__":
    key = jax.random.PRNGKey(0)
    k_par, k_img, k_f0, k_f1 = jax.random.split(key, 4)

    C = cfg.FPN.NUM_CHANNEL
    params = init_params(k_par)
    prepped = prep_params(params)             # one-time weight layout prep
    all_anchors = precompute_anchors()        # one-time anchor table

    # image: NCHW; feature maps match backbone_shapes ([16,16] and [8,8])
    image = jax.random.normal(k_img, (1, 3, 64, 64), jnp.float32)
    features = [
        jax.random.normal(k_f0, (1, C, BACKBONE_SHAPES[0][0], BACKBONE_SHAPES[0][1]), jnp.float32),
        jax.random.normal(k_f1, (1, C, BACKBONE_SHAPES[1][0], BACKBONE_SHAPES[1][1]), jnp.float32),
    ]

    proposals = rpn_forward_jit(image, features, prepped, all_anchors)
    jax.block_until_ready(proposals)
    assert proposals.shape == (cfg.RPN.TEST_POST_NMS_TOPK, 4)
    assert bool(jnp.all(jnp.isfinite(proposals)))
    print("KERNEL_OK")
</pallas_src>

<mosaic_0001>
module attributes {stable_mosaic.version = 11 : i64} {
  func.func @rpn_conv_head_kernel(%arg0: i32, %arg1: memref<1x192x32xbf16, #tpu.memory_space<vmem>>, %arg2: memref<9x32x32xbf16, #tpu.memory_space<vmem>>, %arg3: memref<1x32xf32, #tpu.memory_space<vmem>>, %arg4: memref<32x128xbf16, #tpu.memory_space<vmem>>, %arg5: memref<1x128xf32, #tpu.memory_space<vmem>>, %arg6: memref<1x144x128xf32, #tpu.memory_space<vmem>>) attributes {dimension_semantics = [#tpu.dimension_semantics<parallel>], iteration_bounds = array<i64: 3>, scalar_prefetch = 0 : i64, scratch_operands = 0 : i64, tpu.core_type = #tpu.core_type<tc>, window_params = [{transform_indices = @transform_0, window_bounds = array<i64: 1, 192, 32>}, {pipeline_mode = #tpu.pipeline_mode<synchronous>, transform_indices = @transform_1, window_bounds = array<i64: 9, 32, 32>}, {pipeline_mode = #tpu.pipeline_mode<synchronous>, transform_indices = @transform_2, window_bounds = array<i64: 1, 32>}, {pipeline_mode = #tpu.pipeline_mode<synchronous>, transform_indices = @transform_3, window_bounds = array<i64: 32, 128>}, {pipeline_mode = #tpu.pipeline_mode<synchronous>, transform_indices = @transform_4, window_bounds = array<i64: 1, 128>}, {transform_indices = @transform_5, window_bounds = array<i64: 1, 144, 128>}]} {
    %c0 = arith.constant 0 : index
    %c0_0 = arith.constant 0 : index
    %c0_1 = arith.constant 0 : index
    %0 = vector.load %arg1[%c0, %c0_0, %c0_1] : memref<1x192x32xbf16, #tpu.memory_space<vmem>>, vector<1x192x32xbf16>
    %1 = vector.shape_cast %0 : vector<1x192x32xbf16> to vector<192x32xbf16>
    %2 = arith.extf %1 : vector<192x32xbf16> to vector<192x32xf32>
    %cst = arith.constant 0.000000e+00 : f32
    %3 = vector.broadcast %cst : f32 to vector<144x32xf32>
    %4 = vector.extract_strided_slice %2 {offsets = [0, 0], sizes = [144, 32], strides = [1, 1]} : vector<192x32xf32> to vector<144x32xf32>
    %5 = arith.truncf %4 : vector<144x32xf32> to vector<144x32xbf16>
    %c0_2 = arith.constant 0 : index
    %c0_3 = arith.constant 0 : index
    %c0_4 = arith.constant 0 : index
    %6 = vector.load %arg2[%c0_2, %c0_3, %c0_4] : memref<9x32x32xbf16, #tpu.memory_space<vmem>>, vector<1x32x32xbf16>
    %7 = vector.shape_cast %6 : vector<1x32x32xbf16> to vector<32x32xbf16>
    %cst_5 = arith.constant dense<0.000000e+00> : vector<144x32xf32>
    %8 = tpu.matmul %5, %7, %cst_5 {dimension_numbers = #tpu.dot_dimension_numbers<[1], [0], [0], [1], [0, 0, 1, 1], [], []>} : vector<144x32xbf16>, vector<32x32xbf16>, vector<144x32xf32> -> vector<144x32xf32>
    %9 = arith.addf %3, %8 : vector<144x32xf32>
    %10 = vector.extract_strided_slice %2 {offsets = [1, 0], sizes = [144, 32], strides = [1, 1]} : vector<192x32xf32> to vector<144x32xf32>
    %11 = arith.truncf %10 : vector<144x32xf32> to vector<144x32xbf16>
    %c1 = arith.constant 1 : index
    %c0_6 = arith.constant 0 : index
    %c0_7 = arith.constant 0 : index
    %12 = vector.load %arg2[%c1, %c0_6, %c0_7] : memref<9x32x32xbf16, #tpu.memory_space<vmem>>, vector<1x32x32xbf16>
    %13 = vector.shape_cast %12 : vector<1x32x32xbf16> to vector<32x32xbf16>
    %cst_8 = arith.constant dense<0.000000e+00> : vector<144x32xf32>
    %14 = tpu.matmul %11, %13, %cst_8 {dimension_numbers = #tpu.dot_dimension_numbers<[1], [0], [0], [1], [0, 0, 1, 1], [], []>} : vector<144x32xbf16>, vector<32x32xbf16>, vector<144x32xf32> -> vector<144x32xf32>
    %15 = arith.addf %9, %14 : vector<144x32xf32>
    %16 = vector.extract_strided_slice %2 {offsets = [2, 0], sizes = [144, 32], strides = [1, 1]} : vector<192x32xf32> to vector<144x32xf32>
    %17 = arith.truncf %16 : vector<144x32xf32> to vector<144x32xbf16>
    %c2 = arith.constant 2 : index
    %c0_9 = arith.constant 0 : index
    %c0_10 = arith.constant 0 : index
    %18 = vector.load %arg2[%c2, %c0_9, %c0_10] : memref<9x32x32xbf16, #tpu.memory_space<vmem>>, vector<1x32x32xbf16>
    %19 = vector.shape_cast %18 : vector<1x32x32xbf16> to vector<32x32xbf16>
    %cst_11 = arith.constant dense<0.000000e+00> : vector<144x32xf32>
    %20 = tpu.matmul %17, %19, %cst_11 {dimension_numbers = #tpu.dot_dimension_numbers<[1], [0], [0], [1], [0, 0, 1, 1], [], []>} : vector<144x32xbf16>, vector<32x32xbf16>, vector<144x32xf32> -> vector<144x32xf32>
    %21 = arith.addf %15, %20 : vector<144x32xf32>
    %22 = vector.extract_strided_slice %2 {offsets = [18, 0], sizes = [144, 32], strides = [1, 1]} : vector<192x32xf32> to vector<144x32xf32>
    %23 = arith.truncf %22 : vector<144x32xf32> to vector<144x32xbf16>
    %c3 = arith.constant 3 : index
    %c0_12 = arith.constant 0 : index
    %c0_13 = arith.constant 0 : index
    %24 = vector.load %arg2[%c3, %c0_12, %c0_13] : memref<9x32x32xbf16, #tpu.memory_space<vmem>>, vector<1x32x32xbf16>
    %25 = vector.shape_cast %24 : vector<1x32x32xbf16> to vector<32x32xbf16>
    %cst_14 = arith.constant dense<0.000000e+00> : vector<144x32xf32>
    %26 = tpu.matmul %23, %25, %cst_14 {dimension_numbers = #tpu.dot_dimension_numbers<[1], [0], [0], [1], [0, 0, 1, 1], [], []>} : vector<144x32xbf16>, vector<32x32xbf16>, vector<144x32xf32> -> vector<144x32xf32>
    %27 = arith.addf %21, %26 : vector<144x32xf32>
    %28 = vector.extract_strided_slice %2 {offsets = [19, 0], sizes = [144, 32], strides = [1, 1]} : vector<192x32xf32> to vector<144x32xf32>
    %29 = arith.truncf %28 : vector<144x32xf32> to vector<144x32xbf16>
    %c4 = arith.constant 4 : index
    %c0_15 = arith.constant 0 : index
    %c0_16 = arith.constant 0 : index
    %30 = vector.load %arg2[%c4, %c0_15, %c0_16] : memref<9x32x32xbf16, #tpu.memory_space<vmem>>, vector<1x32x32xbf16>
    %31 = vector.shape_cast %30 : vector<1x32x32xbf16> to vector<32x32xbf16>
    %cst_17 = arith.constant dense<0.000000e+00> : vector<144x32xf32>
    %32 = tpu.matmul %29, %31, %cst_17 {dimension_numbers = #tpu.dot_dimension_numbers<[1], [0], [0], [1], [0, 0, 1, 1], [], []>} : vector<144x32xbf16>, vector<32x32xbf16>, vector<144x32xf32> -> vector<144x32xf32>
    %33 = arith.addf %27, %32 : vector<144x32xf32>
    %34 = vector.extract_strided_slice %2 {offsets = [20, 0], sizes = [144, 32], strides = [1, 1]} : vector<192x32xf32> to vector<144x32xf32>
    %35 = arith.truncf %34 : vector<144x32xf32> to vector<144x32xbf16>
    %c5 = arith.constant 5 : index
    %c0_18 = arith.constant 0 : index
    %c0_19 = arith.constant 0 : index
    %36 = vector.load %arg2[%c5, %c0_18, %c0_19] : memref<9x32x32xbf16, #tpu.memory_space<vmem>>, vector<1x32x32xbf16>
    %37 = vector.shape_cast %36 : vector<1x32x32xbf16> to vector<32x32xbf16>
    %cst_20 = arith.constant dense<0.000000e+00> : vector<144x32xf32>
    %38 = tpu.matmul %35, %37, %cst_20 {dimension_numbers = #tpu.dot_dimension_numbers<[1], [0], [0], [1], [0, 0, 1, 1], [], []>} : vector<144x32xbf16>, vector<32x32xbf16>, vector<144x32xf32> -> vector<144x32xf32>
    %39 = arith.addf %33, %38 : vector<144x32xf32>
    %40 = vector.extract_strided_slice %2 {offsets = [36, 0], sizes = [144, 32], strides = [1, 1]} : vector<192x32xf32> to vector<144x32xf32>
    %41 = arith.truncf %40 : vector<144x32xf32> to vector<144x32xbf16>
    %c6 = arith.constant 6 : index
    %c0_21 = arith.constant 0 : index
    %c0_22 = arith.constant 0 : index
    %42 = vector.load %arg2[%c6, %c0_21, %c0_22] : memref<9x32x32xbf16, #tpu.memory_space<vmem>>, vector<1x32x32xbf16>
    %43 = vector.shape_cast %42 : vector<1x32x32xbf16> to vector<32x32xbf16>
    %cst_23 = arith.constant dense<0.000000e+00> : vector<144x32xf32>
    %44 = tpu.matmul %41, %43, %cst_23 {dimension_numbers = #tpu.dot_dimension_numbers<[1], [0], [0], [1], [0, 0, 1, 1], [], []>} : vector<144x32xbf16>, vector<32x32xbf16>, vector<144x32xf32> -> vector<144x32xf32>
    %45 = arith.addf %39, %44 : vector<144x32xf32>
    %46 = vector.extract_strided_slice %2 {offsets = [37, 0], sizes = [144, 32], strides = [1, 1]} : vector<192x32xf32> to vector<144x32xf32>
    %47 = arith.truncf %46 : vector<144x32xf32> to vector<144x32xbf16>
    %c7 = arith.constant 7 : index
    %c0_24 = arith.constant 0 : index
    %c0_25 = arith.constant 0 : index
    %48 = vector.load %arg2[%c7, %c0_24, %c0_25] : memref<9x32x32xbf16, #tpu.memory_space<vmem>>, vector<1x32x32xbf16>
    %49 = vector.shape_cast %48 : vector<1x32x32xbf16> to vector<32x32xbf16>
    %cst_26 = arith.constant dense<0.000000e+00> : vector<144x32xf32>
    %50 = tpu.matmul %47, %49, %cst_26 {dimension_numbers = #tpu.dot_dimension_numbers<[1], [0], [0], [1], [0, 0, 1, 1], [], []>} : vector<144x32xbf16>, vector<32x32xbf16>, vector<144x32xf32> -> vector<144x32xf32>
    %51 = arith.addf %45, %50 : vector<144x32xf32>
    %52 = vector.extract_strided_slice %2 {offsets = [38, 0], sizes = [144, 32], strides = [1, 1]} : vector<192x32xf32> to vector<144x32xf32>
    %53 = arith.truncf %52 : vector<144x32xf32> to vector<144x32xbf16>
    %c8 = arith.constant 8 : index
    %c0_27 = arith.constant 0 : index
    %c0_28 = arith.constant 0 : index
    %54 = vector.load %arg2[%c8, %c0_27, %c0_28] : memref<9x32x32xbf16, #tpu.memory_space<vmem>>, vector<1x32x32xbf16>
    %55 = vector.shape_cast %54 : vector<1x32x32xbf16> to vector<32x32xbf16>
    %cst_29 = arith.constant dense<0.000000e+00> : vector<144x32xf32>
    %56 = tpu.matmul %53, %55, %cst_29 {dimension_numbers = #tpu.dot_dimension_numbers<[1], [0], [0], [1], [0, 0, 1, 1], [], []>} : vector<144x32xbf16>, vector<32x32xbf16>, vector<144x32xf32> -> vector<144x32xf32>
    %57 = arith.addf %51, %56 : vector<144x32xf32>
    %c0_30 = arith.constant 0 : index
    %c0_31 = arith.constant 0 : index
    %58 = vector.load %arg3[%c0_30, %c0_31] : memref<1x32xf32, #tpu.memory_space<vmem>>, vector<1x32xf32>
    %59 = vector.broadcast %58 : vector<1x32xf32> to vector<144x32xf32>
    %60 = arith.addf %57, %59 : vector<144x32xf32>
    %cst_32 = arith.constant 0.000000e+00 : f32
    %61 = vector.broadcast %cst_32 : f32 to vector<144x32xf32>
    %62 = arith.maximumf %60, %61 : vector<144x32xf32>
    %63 = arith.truncf %62 : vector<144x32xf32> to vector<144x32xbf16>
    %c0_33 = arith.constant 0 : index
    %c0_34 = arith.constant 0 : index
    %64 = vector.load %arg4[%c0_33, %c0_34] : memref<32x128xbf16, #tpu.memory_space<vmem>>, vector<32x128xbf16>
    %cst_35 = arith.constant dense<0.000000e+00> : vector<144x128xf32>
    %65 = tpu.matmul %63, %64, %cst_35 {dimension_numbers = #tpu.dot_dimension_numbers<[1], [0], [0], [1], [0, 0, 1, 1], [], []>} : vector<144x32xbf16>, vector<32x128xbf16>, vector<144x128xf32> -> vector<144x128xf32>
    %c0_36 = arith.constant 0 : index
    %c0_37 = arith.constant 0 : index
    %66 = vector.load %arg5[%c0_36, %c0_37] : memref<1x128xf32, #tpu.memory_space<vmem>>, vector<1x128xf32>
    %67 = vector.broadcast %66 : vector<1x128xf32> to vector<144x128xf32>
    %68 = arith.addf %65, %67 : vector<144x128xf32>
    %c0_38 = arith.constant 0 : index
    %c0_39 = arith.constant 0 : index
    %c0_40 = arith.constant 0 : index
    %69 = vector.load %arg6[%c0_38, %c0_39, %c0_40] : memref<1x144x128xf32, #tpu.memory_space<vmem>>, vector<1x144x128xf32>
    %70 = vector.shape_cast %69 : vector<1x144x128xf32> to vector<144x128xf32>
    %71 = vector.shape_cast %68 : vector<144x128xf32> to vector<1x144x128xf32>
    tpu.vector_store %arg6[%c0_38, %c0_39, %c0_40], %71 {strides = array<i32>} : memref<1x144x128xf32, #tpu.memory_space<vmem>>, vector<1x144x128xf32>,
    return
  }
  func.func @transform_0(%arg0: i32) -> (i32, i32, i32) {
    %c0_i32 = arith.constant 0 : i32
    %c0_i32_0 = arith.constant 0 : i32
    %c0_i32_1 = arith.constant 0 : i32
    return %arg0, %c0_i32, %c0_i32_0 : i32, i32, i32
  }
  func.func @transform_1(%arg0: i32) -> (i32, i32, i32) {
    %c0_i32 = arith.constant 0 : i32
    %c0_i32_0 = arith.constant 0 : i32
    %c0_i32_1 = arith.constant 0 : i32
    %c0_i32_2 = arith.constant 0 : i32
    return %c0_i32, %c0_i32_0, %c0_i32_1 : i32, i32, i32
  }
  func.func @transform_2(%arg0: i32) -> (i32, i32) {
    %c0_i32 = arith.constant 0 : i32
    %c0_i32_0 = arith.constant 0 : i32
    %c0_i32_1 = arith.constant 0 : i32
    return %c0_i32, %c0_i32_0 : i32, i32
  }
  func.func @transform_3(%arg0: i32) -> (i32, i32) {
    %c0_i32 = arith.constant 0 : i32
    %c0_i32_0 = arith.constant 0 : i32
    %c0_i32_1 = arith.constant 0 : i32
    return %c0_i32, %c0_i32_0 : i32, i32
  }
  func.func @transform_4(%arg0: i32) -> (i32, i32) {
    %c0_i32 = arith.constant 0 : i32
    %c0_i32_0 = arith.constant 0 : i32
    %c0_i32_1 = arith.constant 0 : i32
    return %c0_i32, %c0_i32_0 : i32, i32
  }
  func.func @transform_5(%arg0: i32) -> (i32, i32, i32) {
    %c0_i32 = arith.constant 0 : i32
    %c0_i32_0 = arith.constant 0 : i32
    %c0_i32_1 = arith.constant 0 : i32
    return %arg0, %c0_i32, %c0_i32_0 : i32, i32, i32
  }
}

</mosaic_0001>

<bundles_post_ra>
// kernel: rpn_forward.1
= control target key start
LH: loop header
LB: loop body
LE: loop exit
PB: predicated region body
PF: predicated region fallthrough
CT: control target
= control target key end

     0   :  { %s3006_s18 = smov 0   ;;  %s3966_s0 = inlined_call_operand.vmem [shape: bf16[3,192,32], index: 0, kind: input, shape index: {}]   ;;  %s3967_s1 = inlined_call_operand.vmem [shape: bf16[9,32,32], index: 1, kind: input, shape index: {}]   ;;  %s3968_s2 = inlined_call_operand.vmem [shape: f32[1,32], index: 2, kind: input, shape index: {}]   ;;  %s3969_s3 = inlined_call_operand.vmem [shape: bf16[32,128], index: 3, kind: input, shape index: {}]   ;;  %s3970_s4 = inlined_call_operand.vmem [shape: f32[1,128], index: 4, kind: input, shape index: {}]   ;;  %s3971_s5 = inlined_call_operand.vmem [shape: f32[3,144,128], index: 5, kind: output, shape index: {}]  }
   0x1 LB: > { %s2241_s19 = sadd.s32 4294967295, %s2972_s18   ;;  %p2245_p0 = scmp.ge.s32.totalorder %s2972_s18, 1  ;;  %s2972_s18 = sphi %s3006_s18, %s15_s18  }
   0x2   : > { %p187_p1 = scmp.lt.s32.totalorder %s2972_s18, 4 }
   0x4   : > { %p188_p2 = pnand %p2245_p0, %p187_p1 }
   0x5   : > { %p215_p3 = scmp.lt.s32.totalorder (!%p188_p2), %s2241_s19, 2 }
   0x6   : > { %191 = sbr.rel (%p188_p2) target bundleno = 780 (0x30c), region = 40 }
   0xb   : > { %v2930_v0 = vld [vmem:[%s3967_s1 + $0x18] sm:$0xff]   ;;  %v2974_v1 = vmov 0.0   ;;  %v2931_v2 = vld [vmem:[%s3967_s1 + $0x8] sm:$0xff]   ;;  %v2932_v3 = vld [vmem:[%s3967_s1 + $0x10] sm:$0xff]   ;;  %vm2975_vm0 = vmmov 0   ;;  %s3973_s19 = smov (!%p215_p3, %s2241_s19), 2 }
   0xc   : > { %2518 = vmatprep.subr.bf16.mxu0 %v2974_v1  ;;  %2558 = vmatprep.subr.bf16.mxu1 %v2974_v1  ;;  %v2933_v4 = vld [vmem:[%s3967_s1] sm:$0xff]   ;;  %s2918_s28 = smul.u32 96, %s3973_s19  ;;  %vm380_vm1 = vcmask 261120   ;;  %v2947_v5 = vld [vmem:[%s3967_s1 + $0x38] sm:$0xff]   ;;  %v2948_v12 = vld [vmem:[%s3967_s1 + $0x30] sm:$0xff]   ;;  %vm663_vm3 = vcmask 1046528  }
   0xd   : > { %2519 = vmatpush3.bf16.msra.mxu0 %v2930_v0  ;;  %2522 = vmatprep.mubr.msk.bf16.mxu0 %vm2975_vm0, %v2974_v1  ;;  %vm291_vm2 = vsmask.f32 7424  ;;  %v2936_v15 = vld [vmem:[%s3967_s1 + $0x28] sm:$0xff]   ;;  %v2941_v23 = vld [vmem:[%s3967_s1 + $0x20] sm:$0xff]   ;;  %vm1221_vm4 = vcmask 1045504   ;;  %vm1779_vm7 = vcmask 1044480  }
   0xe   : > { %2559 = vmatpush3.bf16.msra.mxu1 %v2931_v2  ;;  %2520 = vmatprep.subr.bf16.mxu0 %v2974_v1  ;;  %s3041_s6 = scalar_lea.vmem %s3966_s0, %s2918_s28  ;;  %vm1004_vm5 = vsmask.f32 6400  ;;  %vm1562_vm6 = vsmask.f32 5376  ;;  %s2919_s20 = smul.u32 144, %s3973_s19 }
   0xf   : > { %2560 = vmatprep.subr.bf16.mxu1 %v2974_v1  ;;  %2562 = vmatprep.mubr.msk.bf16.mxu1 %vm2975_vm0, %v2974_v1  ;;  %v2934_v6 = vld [vmem:[%s3041_s6] sm:$0xff]   ;;  %v3049_v7 = vld [vmem:[%s3041_s6 + $0x8] sm:$0xff]   ;;  %v3054_v11 = vld [vmem:[%s3041_s6 + $0x10] sm:$0xff]  }
  0x10   : > { %v293_v8 = vshrl.u32 %v2934_v6, 16  ;;  %v295_v9 = vshll.u32 %v2934_v6, 16  ;;  %v300_v10 = vshll.u32 %v3049_v7, 16  ;;  %v304_v17 = vshrl.u32 %v3049_v7, 16  ;;  %v3076_v22 = vld [vmem:[%s3041_s6 + $0x18] sm:$0xff]   ;;  %v3109_v33 = vld [vmem:[%s3041_s6 + $0x20] sm:$0xff]   ;;  %s3925_s25 = scalar_lea.vmem %s3971_s5, %s2919_s20 }
  0x11   : > { %2521 = vmatpush3.bf16.msra.mxu0 %v2932_v3  ;;  %v3067_v18 = vshll.u32 %v3054_v11, 16  ;;  %v664_v24 = vrot.slane %v2934_v6, 1  ;;  %v3087_v25 = vshrl.u32 %v3054_v11, 16  ;;  %v3091_v27 = vshll.u32 %v3076_v22, 16  ;;  %v3095_v29 = vld [vmem:[%s3041_s6 + $0x48] sm:$0xf] }
  0x12   : > { %2561 = vmatpush3.bf16.msra.mxu1 %v2933_v4  ;;  %2598 = vmatprep.subr.bf16.mxu0 %v2974_v1  ;;  %v297_v13 = vrot.slane %v295_v9, 1  ;;  %v302_v14 = vrot.slane %v300_v10, 1  ;;  %v665_v28 = vrot.slane %v3049_v7, 1  ;;  %v3103_v31 = vrot.slane %v300_v10, 2  ;;  %v3116_v36 = vld [vmem:[%s3041_s6 + $0x40] sm:$0xff]   ;;  %v3146_v47 = vld [vmem:[%s3041_s6 + $0x28] sm:$0xff]  }
  0x13   : > { %2638 = vmatprep.subr.bf16.mxu1 %v2974_v1  ;;  %v310_v21 = vrot.slane %v3067_v18, 1  ;;  %v3106_v32 = vrot.slane %v304_v17, 1  ;;  %v318_v35 = vrot.slane %v3091_v27, 1  ;;  %v2257_v37 = vcombine.low %v3095_v29, %v3095_v29  ;;  %v3165_v53 = vld [vmem:[%s3041_s6 + $0x30] sm:$0xff]   ;;  %v3184_v59 = vld [vmem:[%s3041_s6 + $0x38] sm:$0xff]  }
  0x14   : > { %v298_v16 = vor.u32 %v297_v13, %v293_v8  ;;  %v306_v20 = vor.u32 %v304_v17, %v302_v14  ;;  %v3101_v30 = vsel %vm663_vm3, %v664_v24, %v665_v28  ;;  %v3125_v38 = vrot.slane %v3116_v36, 1  ;;  %v2953_v17 = vld [vmem:[%s3967_s1 + $0x58] sm:$0xff]   ;;  %v2950_v24 = vld [vmem:[%s3967_s1 + $0x40] sm:$0xff]  }
  0x15   : > { %2563 = vmatmul.mubr.msk.bf16.vlgmr.msra.gmra.mxu1 %vm380_vm1, %v2934_v6  ;;  %v314_v34 = vor.u32 %v3087_v25, %v310_v21  ;;  %v681_v39 = vrot.slane %v2257_v37, 1  ;;  %v3128_v40 = vshrl.u32 %v3076_v22, 16  ;;  %v3132_v42 = vshll.u32 %v3109_v33, 16 }
  0x16   : > { %2566 = vmatprep.mubr.msk.bf16.mxu1 %vm2975_vm0, %v2974_v1  ;;  %2639 = vmatpush3.bf16.msra.mxu1 %v2947_v5  ;;  %v303_v19 = vsel %vm291_vm2, %v298_v16, %v302_v14  ;;  %v311_v26 = vsel %vm291_vm2, %v306_v20, %v310_v21  ;;  %v1007_v44 = vor.u32 %v3103_v31, %v3106_v32  ;;  %v3154_v49 = vshrl.u32 %v3109_v33, 16  ;;  %v2954_v20 = vld [vmem:[%s3967_s1 + $0x50] sm:$0xff]   ;;  %v2949_v21 = vld [vmem:[%s3967_s1 + $0x48] sm:$0xff]   ;;  %v2956_v32 = vld [vmem:[%s3967_s1 + $0x60] sm:$0xff]  }
  0x17   : > { %2640 = vmatprep.subr.bf16.mxu1 %v2974_v1  ;;  %2523 = vmatmul.mubr.msk.bf16.vlgmr.msra.gmra.mxu0 %vm380_vm1, %v303_v19  ;;  %v319_v41 = vsel %vm291_vm2, %v314_v34, %v318_v35  ;;  %v3136_v43 = vsel %vm663_vm3, %v3125_v38, %v681_v39  ;;  %v322_v45 = vor.u32 %v3128_v40, %v318_v35  ;;  %v326_v46 = vrot.slane %v3132_v42, 1 }
  0x18   : > { %2599 = vmatpush3.bf16.msra.mxu0 %v2936_v15  ;;  %2526 = vmatprep.mubr.msk.bf16.mxu0 %vm2975_vm0, %v2974_v1  ;;  %v3157_v50 = vshll.u32 %v3146_v47, 16  ;;  %v3173_v55 = vshrl.u32 %v3146_v47, 16  ;;  %v3176_v56 = vshll.u32 %v3165_v53, 16  ;;  %v3192_v61 = vshrl.u32 %v3165_v53, 16 }
  0x19   : > { %2600 = vmatprep.subr.bf16.mxu0 %v2974_v1  ;;  %v327_v48 = vsel %vm291_vm2, %v322_v45, %v326_v46  ;;  %v330_v51 = vor.u32 %v3154_v49, %v326_v46  ;;  %v3195_v62 = vshll.u32 %v3184_v59, 16  ;;  %v3208_v3 = vshrl.u32 %v3184_v59, 16  ;;  %v245_v45 = vld [vmem:[%s3041_s6 + $0x4c] sm:$0xf] }
  0x1a   : > { %2641 = vmatpush3.bf16.msra.mxu1 %v2948_v12  ;;  %v334_v52 = vrot.slane %v3157_v50, 1  ;;  %v342_v58 = vrot.slane %v3176_v56, 1  ;;  %v3211_v4 = vshll.u32 %v3116_v36, 16  ;;  %v3224_v9 = vshrl.u32 %v3116_v36, 16 }
  0x1b   : > { %2718 = vmatprep.subr.bf16.mxu1 %v2974_v1  ;;  %v350_v0 = vrot.slane %v3195_v62, 1  ;;  %v364_v10 = vshll.u32 %v2257_v37, 16  ;;  %v667_v14 = vrot.slane %v3054_v11, 1  ;;  %v669_v19 = vrot.slane %v3076_v22, 1 }
  0x1c   : > { %2601 = vmatpush3.bf16.msra.mxu0 %v2941_v23  ;;  %v335_v54 = vsel %vm291_vm2, %v330_v51, %v334_v52  ;;  %v338_v57 = vor.u32 %v3173_v55, %v334_v52  ;;  %v346_v63 = vor.u32 %v3192_v61, %v342_v58  ;;  %v358_v6 = vrot.slane %v3211_v4, 1  ;;  %v3316_v52 = vld [vmem:[%s3041_s6 + $0x50] sm:$0xf] }
  0x1d   : > { %2567 = vmatmul.mubr.msk.bf16.gmra.mxu1 %vm380_vm1, %v3049_v7  ;;  %2678 = vmatprep.subr.bf16.mxu0 %v2974_v1  ;;  %v354_v5 = vor.u32 %v3208_v3, %v350_v0  ;;  %v366_v13 = vrot.slane %v364_v10, 1  ;;  %v668_v16 = vsel %vm663_vm3, %v665_v28, %v667_v14  ;;  %v670_v23 = vsel %vm663_vm3, %v667_v14, %v669_v19 }
  0x1e   : > { %2570 = vmatprep.mubr.msk.bf16.mxu1 %vm2975_vm0, %v2974_v1  ;;  %v343_v60 = vsel %vm291_vm2, %v338_v57, %v342_v58  ;;  %v351_v2 = vsel %vm291_vm2, %v346_v63, %v350_v0  ;;  %v362_v12 = vor.u32 %v3224_v9, %v358_v6  ;;  %v675_v35 = vrot.slane %v3165_v53, 1 }
  0x1f   : > { %2527 = vmatmul.mubr.msk.bf16.gmra.mxu0 %vm380_vm1, %v311_v26  ;;  %v359_v8 = vsel %vm291_vm2, %v354_v5, %v358_v6  ;;  %v671_v26 = vrot.slane %v3109_v33, 1  ;;  %v677_v39 = vrot.slane %v3184_v59, 1  ;;  %v3304_v46 = vcombine.low %v3095_v29, %v245_v45  ;;  %v2957_v5 = vld [vmem:[%s3967_s1 + $0x78] sm:$0xff]   ;;  %v2958_v6 = vld [vmem:[%s3967_s1 + $0x70] sm:$0xff]  }
  0x20   : > { %2530 = vmatprep.mubr.msk.bf16.mxu0 %vm2975_vm0, %v2974_v1  ;;  %v367_v15 = vsel %vm291_vm2, %v362_v12, %v366_v13  ;;  %v1008_v63 = vrot.slane %v3087_v25, 1  ;;  %v1009_v0 = vrot.slane %v3067_v18, 2  ;;  %v1012_v10 = vrot.slane %v3128_v40, 1 }
  0x21   : > { %v672_v28 = vsel %vm663_vm3, %v669_v19, %v671_v26  ;;  %v854_v51 = vrot.slane %v3304_v46, 1  ;;  %v1013_v12 = vrot.slane %v3091_v27, 2  ;;  %v1233_v45 = vrot.slane %v3184_v59, 2 }
  0x23   : > { %v855_v29 = vsel %vm663_vm3, %v3125_v38, %v854_v51  ;;  %v1014_v31 = vor.u32 %v1013_v12, %v1012_v10 }
  0x25   : > { %2571 = vmatmul.mubr.msk.bf16.gmra.mxu1 %vm380_vm1, %v3054_v11 }
  0x26   : > { %2574 = vmatprep.mubr.msk.bf16.mxu1 %vm2975_vm0, %v2974_v1 }
  0x27   : > { %2531 = vmatmul.mubr.msk.bf16.gmra.mxu0 %vm380_vm1, %v319_v41  ;;  %v678_v41 = vsel %vm663_vm3, %v675_v35, %v677_v39 }
  0x28   : > { %2534 = vmatprep.mubr.msk.bf16.mxu0 %vm2975_vm0, %v2974_v1 }
  0x2d   : > { %2575 = vmatmul.mubr.msk.bf16.gmra.mxu1 %vm380_vm1, %v3076_v22 }
  0x2e   : > { %2578 = vmatprep.mubr.msk.bf16.mxu1 %vm2975_vm0, %v2974_v1 }
  0x2f   : > { %2535 = vmatmul.mubr.msk.bf16.gmra.mxu0 %vm380_vm1, %v327_v48  ;;  %v680_v48 = vsel %vm663_vm3, %v677_v39, %v3125_v38  ;;  %v1222_v38 = vrot.slane %v3049_v7, 2  ;;  %v1010_v7 = vor.u32 %v1009_v0, %v1008_v63  ;;  %v1032_v63 = vrot.slane %v3224_v9, 1 }
  0x30   : > { %2538 = vmatprep.mubr.msk.bf16.mxu0 %vm2975_vm0, %v2974_v1  ;;  %v1033_v0 = vrot.slane %v3211_v4, 2 }
  0x31   : > { %v1015_v14 = vsel %vm1004_vm5, %v1010_v7, %v1014_v31 }
  0x35   : > { %2579 = vmatmul.mubr.msk.bf16.gmra.mxu1 %vm380_vm1, %v3109_v33 }
  0x36   : > { %2582 = vmatprep.mubr.msk.bf16.mxu1 %vm2975_vm0, %v2974_v1 }
  0x37   : > { %2539 = vmatmul.mubr.msk.bf16.gmra.mxu0 %vm380_vm1, %v335_v54  ;;  %v3322_v54 = vcombine.low %v3316_v52, %v3316_v52 }
  0x38   : > { %2542 = vmatprep.mubr.msk.bf16.mxu0 %vm2975_vm0, %v2974_v1 }
  0x39   : > { %v856_v57 = vrot.slane %v3322_v54, 1 }
  0x3b   : > { %v857_v58 = vsel %vm663_vm3, %v854_v51, %v856_v57  ;;  %v1028_v51 = vrot.slane %v3208_v3, 1 }
  0x3d   : > { %2583 = vmatmul.mubr.msk.bf16.gmra.mxu1 %vm380_vm1, %v3146_v47 }
  0x3e   : > { %2586 = vmatprep.mubr.msk.bf16.mxu1 %vm2975_vm0, %v2974_v1 }
  0x3f   : > { %2543 = vmatmul.mubr.msk.bf16.gmra.mxu0 %vm380_vm1, %v343_v60  ;;  %v1223_v60 = vrot.slane %v3054_v11, 2  ;;  %v1225_v11 = vrot.slane %v3076_v22, 2 }
  0x40   : > { %2546 = vmatprep.mubr.msk.bf16.mxu0 %vm2975_vm0, %v2974_v1 }
  0x41   : > { %v3368_v13 = vsel %vm1221_vm4, %v1223_v60, %v1225_v11 }
  0x45   : > { %2587 = vmatmul.mubr.msk.bf16.gmra.mxu1 %vm380_vm1, %v3165_v53 }
  0x46   : > { %2590 = vmatprep.mubr.msk.bf16.mxu1 %vm2975_vm0, %v2974_v1 }
  0x47   : > { %2547 = vmatmul.mubr.msk.bf16.gmra.mxu0 %vm380_vm1, %v351_v2  ;;  %v1224_v2 = vsel %vm1221_vm4, %v1222_v38, %v1223_v60  ;;  %v1235_v38 = vrot.slane %v3116_v36, 2 }
  0x48   : > { %2550 = vmatprep.mubr.msk.bf16.mxu0 %vm2975_vm0, %v2974_v1 }
  0x4d   : > { %2591 = vmatmul.mubr.msk.bf16.gmra.mxu1 %vm380_vm1, %v3184_v59 }
  0x4e   : > { %2594 = vmatprep.mubr.msk.bf16.mxu1 %vm2975_vm0, %v2974_v1 }
  0x4f   : > { %2551 = vmatmul.mubr.msk.bf16.gmra.mxu0 %vm380_vm1, %v359_v8  ;;  %v2955_v8 = vld [vmem:[%s3967_s1 + $0x68] sm:$0xff]  }
  0x50   : > { %2554 = vmatprep.mubr.msk.bf16.mxu0 %vm2975_vm0, %v2974_v1 }
  0x55   : > { %2595 = vmatmul.mubr.msk.bf16.gmra.mxu1 %vm380_vm1, %v3116_v36  ;;  %v1040_v36 = vshll.u32 %v3304_v46, 16 }
  0x56   : > { %2642 = vmatprep.mubr.msk.bf16.mxu1 %vm2975_vm0, %v2974_v1 }
  0x57   : > { %2555 = vmatmul.mubr.msk.bf16.gmra.mxu0 %vm380_vm1, %v367_v15  ;;  %v1016_v15 = vrot.slane %v3154_v49, 1 }
  0x58   : > { %2602 = vmatprep.mubr.msk.bf16.mxu0 %vm2975_vm0, %v2974_v1 }
  0x5d   : > { %2643 = vmatmul.mubr.msk.bf16.vlgmr.msra.gmra.mxu1 %vm380_vm1, %v668_v16 }
  0x5e   : > { %2646 = vmatprep.mubr.msk.bf16.mxu1 %vm2975_vm0, %v2974_v1  ;;  %2719 = vmatpush3.bf16.msra.mxu1 %v2953_v17 }
  0x5f   : > { %2720 = vmatprep.subr.bf16.mxu1 %v2974_v1  ;;  %2603 = vmatmul.mubr.msk.bf16.vlgmr.msra.gmra.mxu0 %vm380_vm1, %v3101_v30  ;;  %v673_v30 = vrot.slane %v3146_v47, 1 }
  0x60   : > { %2679 = vmatpush3.bf16.msra.mxu0 %v2949_v21  ;;  %2606 = vmatprep.mubr.msk.bf16.mxu0 %vm2975_vm0, %v2974_v1 }
  0x61   : > { %2680 = vmatprep.subr.bf16.mxu0 %v2974_v1  ;;  %v674_v34 = vsel %vm663_vm3, %v671_v26, %v673_v30  ;;  %v676_v37 = vsel %vm663_vm3, %v673_v30, %v675_v35  ;;  %v1231_v30 = vrot.slane %v3165_v53, 2  ;;  %v1024_v35 = vrot.slane %v3192_v61, 1 }
  0x62   : > { %2721 = vmatpush3.bf16.msra.mxu1 %v2954_v20  ;;  %v1229_v20 = vrot.slane %v3146_v47, 2 }
  0x63   : > { %2798 = vmatprep.subr.bf16.mxu1 %v2974_v1  ;;  %v3430_v57 = vsel %vm1221_vm4, %v1231_v30, %v1233_v45 }
  0x64   : > { %2681 = vmatpush3.bf16.msra.mxu0 %v2950_v24  ;;  %v1021_v24 = vrot.slane %v3157_v50, 2  ;;  %v3416_v39 = vsel %vm1221_vm4, %v1229_v20, %v1231_v30 }
  0x65   : > { %2647 = vmatmul.mubr.msk.bf16.gmra.mxu1 %vm380_vm1, %v670_v23  ;;  %2758 = vmatprep.subr.bf16.mxu0 %v2974_v1 }
  0x66   : > { %2650 = vmatprep.mubr.msk.bf16.mxu1 %vm2975_vm0, %v2974_v1 }
  0x67   : > { %2607 = vmatmul.mubr.msk.bf16.gmra.mxu0 %vm380_vm1, %v668_v16  ;;  %v1017_v16 = vrot.slane %v3132_v42, 2 }
  0x68   : > { %2610 = vmatprep.mubr.msk.bf16.mxu0 %vm2975_vm0, %v2974_v1 }
  0x69   : > { %v1018_v19 = vor.u32 %v1017_v16, %v1016_v15 }
  0x6b   : > { %v1019_v21 = vsel %vm1004_vm5, %v1014_v31, %v1018_v19  ;;  %v1042_v31 = vrot.slane %v1040_v36, 2 }
  0x6d   : > { %2651 = vmatmul.mubr.msk.bf16.gmra.mxu1 %vm380_vm1, %v672_v28 }
  0x6e   : > { %2654 = vmatprep.mubr.msk.bf16.mxu1 %vm2975_vm0, %v2974_v1 }
  0x6f   : > { %2611 = vmatmul.mubr.msk.bf16.gmra.mxu0 %vm380_vm1, %v670_v23  ;;  %v1020_v23 = vrot.slane %v3173_v55, 1 }
  0x70   : > { %2614 = vmatprep.mubr.msk.bf16.mxu0 %vm2975_vm0, %v2974_v1 }
  0x75   : > { %2655 = vmatmul.mubr.msk.bf16.gmra.mxu1 %vm380_vm1, %v674_v34 }
  0x76   : > { %2658 = vmatprep.mubr.msk.bf16.mxu1 %vm2975_vm0, %v2974_v1 }
  0x77   : > { %2615 = vmatmul.mubr.msk.bf16.gmra.mxu0 %vm380_vm1, %v672_v28  ;;  %v1022_v28 = vor.u32 %v1021_v24, %v1020_v23  ;;  %v1239_v24 = vrot.slane %v3322_v54, 2 }
  0x78   : > { %2618 = vmatprep.mubr.msk.bf16.mxu0 %vm2975_vm0, %v2974_v1 }
  0x7d   : > { %2659 = vmatmul.mubr.msk.bf16.gmra.mxu1 %vm380_vm1, %v676_v37 }
  0x7e   : > { %2662 = vmatprep.mubr.msk.bf16.mxu1 %vm2975_vm0, %v2974_v1 }
  0x7f   : > { %2619 = vmatmul.mubr.msk.bf16.gmra.mxu0 %vm380_vm1, %v674_v34  ;;  %v1023_v34 = vsel %vm1004_vm5, %v1018_v19, %v1022_v28  ;;  %v1046_v19 = vshrl.u32 %v3322_v54, 16 }
  0x80   : > { %2622 = vmatprep.mubr.msk.bf16.mxu0 %vm2975_vm0, %v2974_v1 }
  0x85   : > { %2663 = vmatmul.mubr.msk.bf16.gmra.mxu1 %vm380_vm1, %v678_v41 }
  0x86   : > { %2666 = vmatprep.mubr.msk.bf16.mxu1 %vm2975_vm0, %v2974_v1 }
  0x87   : > { %2623 = vmatmul.mubr.msk.bf16.gmra.mxu0 %vm380_vm1, %v676_v37  ;;  %v1025_v37 = vrot.slane %v3176_v56, 2 }
  0x88   : > { %2626 = vmatprep.mubr.msk.bf16.mxu0 %vm2975_vm0, %v2974_v1 }
  0x8d   : > { %2667 = vmatmul.mubr.msk.bf16.gmra.mxu1 %vm380_vm1, %v680_v48 }
  0x8e   : > { %2670 = vmatprep.mubr.msk.bf16.mxu1 %vm2975_vm0, %v2974_v1 }
  0x8f   : > { %2627 = vmatmul.mubr.msk.bf16.gmra.mxu0 %vm380_vm1, %v678_v41  ;;  %v1026_v41 = vor.u32 %v1025_v37, %v1024_v35  ;;  %v1048_v37 = vrot.slane %v1046_v19, 1  ;;  %v1571_v19 = vrot.slane %v3132_v42, 3 }
  0x90   : > { %2630 = vmatprep.mubr.msk.bf16.mxu0 %vm2975_vm0, %v2974_v1 }
  0x95   : > { %2671 = vmatmul.mubr.msk.bf16.gmra.mxu1 %vm380_vm1, %v855_v29  ;;  %v1029_v29 = vrot.slane %v3195_v62, 2 }
  0x96   : > { %2674 = vmatprep.mubr.msk.bf16.mxu1 %vm2975_vm0, %v2974_v1 }
  0x97   : > { %2631 = vmatmul.mubr.msk.bf16.gmra.mxu0 %vm380_vm1, %v680_v48  ;;  %v1027_v48 = vsel %vm1004_vm5, %v1022_v28, %v1026_v41 }
  0x98   : > { %2634 = vmatprep.mubr.msk.bf16.mxu0 %vm2975_vm0, %v2974_v1 }
  0x9d   : > { %2675 = vmatmul.mubr.msk.bf16.gmra.mxu1 %vm380_vm1, %v857_v58  ;;  %v1030_v58 = vor.u32 %v1029_v29, %v1028_v51  ;;  %v1563_v29 = vrot.slane %v3087_v25, 2 }
  0x9e   : > { %2722 = vmatprep.mubr.msk.bf16.mxu1 %vm2975_vm0, %v2974_v1 }
  0x9f   : > { %2635 = vmatmul.mubr.msk.bf16.gmra.mxu0 %vm380_vm1, %v3136_v43  ;;  %v1011_v43 = vsel %vm1004_vm5, %v1007_v44, %v1010_v7  ;;  %v1227_v44 = vrot.slane %v3109_v33, 2  ;;  %v1031_v60 = vsel %vm1004_vm5, %v1026_v41, %v1030_v58  ;;  %v1034_v7 = vor.u32 %v1033_v0, %v1032_v63 }
  0xa0   : > { %2682 = vmatprep.mubr.msk.bf16.mxu0 %vm2975_vm0, %v2974_v1 }
  0xa1   : > { %v3388_v17 = vsel %vm1221_vm4, %v1225_v11, %v1227_v44  ;;  %v3402_v26 = vsel %vm1221_vm4, %v1227_v44, %v1229_v20  ;;  %v1037_v11 = vshrl.u32 %v3304_v46, 16  ;;  %v1049_v20 = vshll.u32 %v3322_v54, 16 }
  0xa2   : > { %v1564_v54 = vrot.slane %v3067_v18, 3 }
  0xa3   : > { %v1039_v12 = vrot.slane %v1037_v11, 1  ;;  %v1051_v41 = vrot.slane %v1049_v20, 2 }
  0xa4   : > { %v1565_v18 = vor.u32 %v1564_v54, %v1563_v29 }
  0xa5   : > { %2723 = vmatmul.mubr.msk.bf16.vlgmr.msra.gmra.mxu1 %vm380_vm1, %v1224_v2  ;;  %v3444_v2 = vsel %vm1221_vm4, %v1233_v45, %v1235_v38  ;;  %v1043_v16 = vor.u32 %v1042_v31, %v1039_v12 }
  0xa6   : > { %2726 = vmatprep.mubr.msk.bf16.mxu1 %vm2975_vm0, %v2974_v1  ;;  %2799 = vmatpush3.bf16.msra.mxu1 %v2957_v5 }
  0xa7   : > { %2800 = vmatprep.subr.bf16.mxu1 %v2974_v1  ;;  %2683 = vmatmul.mubr.msk.bf16.vlgmr.msra.gmra.mxu0 %vm380_vm1, %v1011_v43  ;;  %v3456_v43 = vrot.slane %v3304_v46, 2  ;;  %v1044_v35 = vsel %vm1004_vm5, %v1034_v7, %v1043_v16 }
  0xa8   : > { %2759 = vmatpush3.bf16.msra.mxu0 %v2955_v8  ;;  %2686 = vmatprep.mubr.msk.bf16.mxu0 %vm2975_vm0, %v2974_v1  ;;  %v1035_v8 = vsel %vm1004_vm5, %v1030_v58, %v1034_v7  ;;  %v1566_v58 = vrot.slane %v3128_v40, 2 }
  0xa9   : > { %2760 = vmatprep.subr.bf16.mxu0 %v2974_v1  ;;  %v3465_v44 = vsel %vm1221_vm4, %v1235_v38, %v3456_v43  ;;  %v1240_v51 = vsel %vm1221_vm4, %v3456_v43, %v1239_v24  ;;  %v1567_v38 = vrot.slane %v3091_v27, 3 }
  0xaa   : > { %2801 = vmatpush3.bf16.msra.mxu1 %v2958_v6 }
  0xab   : > { %2878 = vmatprep.subr.bf16.mxu1 %v2974_v1  ;;  %v1568_v25 = vor.u32 %v1567_v38, %v1566_v58  ;;  %v2960_v38 = vld [vmem:[%s3967_s1 + $0x80] sm:$0xff]  }
  0xac   : > { %2761 = vmatpush3.bf16.msra.mxu0 %v2956_v32 }
  0xad   : > { %2727 = vmatmul.mubr.msk.bf16.gmra.mxu1 %vm380_vm1, %v3368_v13  ;;  %2838 = vmatprep.subr.bf16.mxu0 %v2974_v1 }
  0xae   : > { %2730 = vmatprep.mubr.msk.bf16.mxu1 %vm2975_vm0, %v2974_v1 }
  0xaf   : > { %2687 = vmatmul.mubr.msk.bf16.gmra.mxu0 %vm380_vm1, %v1015_v14 }
  0xb0   : > { %2690 = vmatprep.mubr.msk.bf16.mxu0 %vm2975_vm0, %v2974_v1 }
  0xb5   : > { %2731 = vmatmul.mubr.msk.bf16.gmra.mxu1 %vm380_vm1, %v3388_v17 }
  0xb6   : > { %2734 = vmatprep.mubr.msk.bf16.mxu1 %vm2975_vm0, %v2974_v1 }
  0xb7   : > { %2691 = vmatmul.mubr.msk.bf16.gmra.mxu0 %vm380_vm1, %v1019_v21 }
  0xb8   : > { %2694 = vmatprep.mubr.msk.bf16.mxu0 %vm2975_vm0, %v2974_v1 }
  0xbd   : > { %2735 = vmatmul.mubr.msk.bf16.gmra.mxu1 %vm380_vm1, %v3402_v26 }
  0xbe   : > { %2738 = vmatprep.mubr.msk.bf16.mxu1 %vm2975_vm0, %v2974_v1 }
  0xbf   : > { %2695 = vmatmul.mubr.msk.bf16.gmra.mxu0 %vm380_vm1, %v1023_v34 }
  0xc0   : > { %2698 = vmatprep.mubr.msk.bf16.mxu0 %vm2975_vm0, %v2974_v1 }
  0xc5   : > { %2739 = vmatmul.mubr.msk.bf16.gmra.mxu1 %vm380_vm1, %v3416_v39 }
  0xc6   : > { %2742 = vmatprep.mubr.msk.bf16.mxu1 %vm2975_vm0, %v2974_v1 }
  0xc7   : > { %2699 = vmatmul.mubr.msk.bf16.gmra.mxu0 %vm380_vm1, %v1027_v48 }
  0xc8   : > { %2702 = vmatprep.mubr.msk.bf16.mxu0 %vm2975_vm0, %v2974_v1 }
  0xcd   : > { %2743 = vmatmul.mubr.msk.bf16.gmra.mxu1 %vm380_vm1, %v3430_v57 }
  0xce   : > { %2746 = vmatprep.mubr.msk.bf16.mxu1 %vm2975_vm0, %v2974_v1 }
  0xcf   : > { %2703 = vmatmul.mubr.msk.bf16.gmra.mxu0 %vm380_vm1, %v1031_v60 }
  0xd0   : > { %2706 = vmatprep.mubr.msk.bf16.mxu0 %vm2975_vm0, %v2974_v1 }
  0xd5   : > { %v577_v5 = vpop.f32.mrf.mxu1  ;;  %2747 = vmatmul.mubr.msk.bf16.gmra.mxu1 %vm380_vm1, %v3444_v2 }
  0xd6   : > { %2750 = vmatprep.mubr.msk.bf16.mxu1 %vm2975_vm0, %v2974_v1 }
  0xd7   : > { %v2564_v6 = vpop.f32.mrf.mxu1  ;;  %v442_v14 = vpop.f32.mrf.mxu0  ;;  %2707 = vmatmul.mubr.msk.bf16.gmra.mxu0 %vm380_vm1, %v1035_v8 }
  0xd8   : > { %v3468_v15 = vadd.f32 %v577_v5, %v442_v14  ;;  %2710 = vmatprep.mubr.msk.bf16.mxu0 %vm2975_vm0, %v2974_v1  ;;  %v1052_v5 = vor.u32 %v1051_v41, %v1048_v37  ;;  %v1570_v14 = vrot.slane %v3154_v49, 2 }
  0xd9   : > { %v580_v10 = vpop.f32.mrf.mxu1  ;;  %v2524_v21 = vpop.f32.mrf.mxu0 }
  0xdb   : > { %v2565_v32 = vpop.f32.mrf.mxu1  ;;  %v445_v28 = vpop.f32.mrf.mxu0 }
  0xdc   : > { %v3479_v34 = vadd.f32 %v580_v10, %v445_v28  ;;  %v1053_v10 = vsel %vm1004_vm5, %v1043_v16, %v1052_v5  ;;  %v1569_v32 = vsel %vm1562_vm6, %v1565_v18, %v1568_v25  ;;  %v1572_v16 = vor.u32 %v1571_v19, %v1570_v14 }
  0xdd   : > { %v585_v23 = vpop.f32.mrf.mxu1  ;;  %2751 = vmatmul.mubr.msk.bf16.gmra.mxu1 %vm380_vm1, %v3465_v44  ;;  %v2525_v45 = vpop.f32.mrf.mxu0 }
  0xde   : > { %2754 = vmatprep.mubr.msk.bf16.mxu1 %vm2975_vm0, %v2974_v1  ;;  %v1573_v45 = vsel %vm1562_vm6, %v1568_v25, %v1572_v16  ;;  %v1578_v25 = vrot.slane %v3192_v61, 2 }
  0xdf   : > { %v2568_v30 = vpop.f32.mrf.mxu1  ;;  %v450_v60 = vpop.f32.mrf.mxu0  ;;  %2711 = vmatmul.mubr.msk.bf16.gmra.mxu0 %vm380_vm1, %v1044_v35  ;;  %v2959_v35 = vld [vmem:[%s3967_s1 + $0x88] sm:$0xff]  }
  0xe0   : > { %v3489_v0 = vadd.f32 %v585_v23, %v450_v60  ;;  %2714 = vmatprep.mubr.msk.bf16.mxu0 %vm2975_vm0, %v2974_v1 }
  0xe1   : > { %v588_v48 = vpop.f32.mrf.mxu1  ;;  %v2528_v7 = vpop.f32.mrf.mxu0 }
  0xe3   : > { %v2569_v63 = vpop.f32.mrf.mxu1  ;;  %v453_v27 = vpop.f32.mrf.mxu0 }
  0xe4   : > { %v3496_v8 = vadd.f32 %v588_v48, %v453_v27  ;;  %v1574_v48 = vrot.slane %v3173_v55, 2  ;;  %v1579_v27 = vrot.slane %v3176_v56, 3 }
  0xe5   : > { %v593_v6 = vpop.f32.mrf.mxu1  ;;  %2755 = vmatmul.mubr.msk.bf16.gmra.mxu1 %vm380_vm1, %v1240_v51  ;;  %v2529_v12 = vpop.f32.mrf.mxu0  ;;  %v1575_v51 = vrot.slane %v3157_v50, 3 }
  0xe6   : > { %2802 = vmatprep.mubr.msk.bf16.mxu1 %vm2975_vm0, %v2974_v1  ;;  %v1580_v61 = vor.u32 %v1579_v27, %v1578_v25 }
  0xe7   : > { %v2572_v40 = vpop.f32.mrf.mxu1  ;;  %v458_v20 = vpop.f32.mrf.mxu0  ;;  %2715 = vmatmul.mubr.msk.bf16.gmra.mxu0 %vm380_vm1, %v1053_v10  ;;  %v1576_v50 = vor.u32 %v1575_v51, %v1574_v48 }
  0xe8   : > { %v3503_v23 = vadd.f32 %v593_v6, %v458_v20  ;;  %2762 = vmatprep.mubr.msk.bf16.mxu0 %vm2975_vm0, %v2974_v1 }
  0xe9   : > { %v596_v31 = vpop.f32.mrf.mxu1  ;;  %v2532_v24 = vpop.f32.mrf.mxu0  ;;  %v1577_v18 = vsel %vm1562_vm6, %v1572_v16, %v1576_v50 }
  0xea   : > { %v1582_v24 = vrot.slane %v3208_v3, 2 }
  0xeb   : > { %v2573_v21 = vpop.f32.mrf.mxu1  ;;  %v461_v49 = vpop.f32.mrf.mxu0 }
  0xec   : > { %v3510_v42 = vadd.f32 %v596_v31, %v461_v49  ;;  %v1581_v21 = vsel %vm1562_vm6, %v1576_v50, %v1580_v61 }
  0xed   : > { %v601_v28 = vpop.f32.mrf.mxu1  ;;  %2803 = vmatmul.mubr.msk.bf16.vlgmr.msra.gmra.mxu1 %vm380_vm1, %v1569_v32  ;;  %v2533_v37 = vpop.f32.mrf.mxu0 }
  0xee   : > { %2806 = vmatprep.mubr.msk.bf16.mxu1 %vm2975_vm0, %v2974_v1 }
  0xef   : > { %v2576_v30 = vpop.f32.mrf.mxu1  ;;  %v466_v29 = vpop.f32.mrf.mxu0  ;;  %2763 = vmatmul.mubr.msk.bf16.vlgmr.msra.gmra.mxu0 %vm380_vm1, %v3368_v13 }
  0xf0   : > { %v3520_v58 = vadd.f32 %v601_v28, %v466_v29  ;;  %2839 = vmatpush3.bf16.msra.mxu0 %v2959_v35  ;;  %2766 = vmatprep.mubr.msk.bf16.mxu0 %vm2975_vm0, %v2974_v1  ;;  %v1583_v28 = vrot.slane %v3195_v62, 3  ;;  %v1586_v29 = vrot.slane %v3224_v9, 2 }
  0xf1   : > { %v604_v41 = vpop.f32.mrf.mxu1  ;;  %v2536_v60 = vpop.f32.mrf.mxu0  ;;  %2840 = vmatprep.subr.bf16.mxu0 %v2974_v1 }
  0xf2   : > { %v1584_v3 = vor.u32 %v1583_v28, %v1582_v24 }
  0xf3   : > { %v2577_v54 = vpop.f32.mrf.mxu1  ;;  %v469_v55 = vpop.f32.mrf.mxu0 }
  0xf4   : > { %v3531_v5 = vadd.f32 %v604_v41, %v469_v55  ;;  %2841 = vmatpush3.bf16.msra.mxu0 %v2960_v38  ;;  %v1585_v51 = vsel %vm1562_vm6, %v1580_v61, %v1584_v3  ;;  %v1587_v54 = vrot.slane %v3211_v4, 3 }
  0xf5   : > { %v609_v63 = vpop.f32.mrf.mxu1  ;;  %2807 = vmatmul.mubr.msk.bf16.gmra.mxu1 %vm380_vm1, %v1573_v45  ;;  %v2537_v7 = vpop.f32.mrf.mxu0 }
  0xf6   : > { %2810 = vmatprep.mubr.msk.bf16.mxu1 %vm2975_vm0, %v2974_v1  ;;  %v1588_v9 = vor.u32 %v1587_v54, %v1586_v29 }
  0xf7   : > { %v2580_v13 = vpop.f32.mrf.mxu1  ;;  %v474_v40 = vpop.f32.mrf.mxu0  ;;  %2767 = vmatmul.mubr.msk.bf16.gmra.mxu0 %vm380_vm1, %v3388_v17 }
  0xf8   : > { %v3538_v12 = vadd.f32 %v609_v63, %v474_v40  ;;  %2770 = vmatprep.mubr.msk.bf16.mxu0 %vm2975_vm0, %v2974_v1  ;;  %v247_v13 = vld [vmem:[%s3041_s6 + $0x54] sm:$0xf]  ;;  %v1589_v27 = vsel %vm1562_vm6, %v1584_v3, %v1588_v9  ;;  %v1590_v40 = vrot.slane %v1037_v11, 2 }
  0xf9   : > { %v612_v6 = vpop.f32.mrf.mxu1  ;;  %v2540_v31 = vpop.f32.mrf.mxu0  ;;  %v3577_v25 = vcombine.low %v3316_v52, %v247_v13 }
  0xfb   : > { %v2581_v10 = vpop.f32.mrf.mxu1  ;;  %v477_v14 = vpop.f32.mrf.mxu0 }
  0xfc   : > { %v3545_v19 = vadd.f32 %v612_v6, %v477_v14  ;;  %v1591_v10 = vrot.slane %v1040_v36, 3  ;;  %v1595_v36 = vshrl.u32 %v3577_v25, 16 }
  0xfd   : > { %v617_v32 = vpop.f32.mrf.mxu1  ;;  %2811 = vmatmul.mubr.msk.bf16.gmra.mxu1 %vm380_vm1, %v1577_v18  ;;  %v2541_v20 = vpop.f32.mrf.mxu0 }
  0xfe   : > { %2814 = vmatprep.mubr.msk.bf16.mxu1 %vm2975_vm0, %v2974_v1  ;;  %v1592_v11 = vor.u32 %v1591_v10, %v1590_v40 }
  0xff   : > { %v2584_v56 = vpop.f32.mrf.mxu1  ;;  %v482_v16 = vpop.f32.mrf.mxu0  ;;  %2771 = vmatmul.mubr.msk.bf16.gmra.mxu0 %vm380_vm1, %v3402_v26 }
 0x100   : > { %v3552_v30 = vadd.f32 %v617_v32, %v482_v16  ;;  %2774 = vmatprep.mubr.msk.bf16.mxu0 %vm2975_vm0, %v2974_v1  ;;  %v1598_v56 = vshll.u32 %v3577_v25, 16  ;;  %v1593_v28 = vsel %vm1562_vm6, %v1588_v9, %v1592_v11  ;;  %v1597_v16 = vrot.slane %v1595_v36, 2 }
 0x101   : > { %v620_v17 = vpop.f32.mrf.mxu1  ;;  %v2544_v35 = vpop.f32.mrf.mxu0 }
 0x102   : > { %v3599_v35 = vld [vmem:[%s3041_s6 + $0x58] ss:$0 sps:$4 sm:$0xff]  }
 0x103   : > { %v2585_v49 = vpop.f32.mrf.mxu1  ;;  %v485_v41 = vpop.f32.mrf.mxu0  ;;  %v1607_v29 = vshll.u32 %v3599_v35, 16 }
 0x104   : > { %v3559_v45 = vadd.f32 %v620_v17, %v485_v41  ;;  %v1600_v49 = vrot.slane %v1598_v56, 3 }
 0x105   : > { %v625_v37 = vpop.f32.mrf.mxu1  ;;  %2815 = vmatmul.mubr.msk.bf16.gmra.mxu1 %vm380_vm1, %v1581_v21  ;;  %v2545_v26 = vpop.f32.mrf.mxu0  ;;  %v1609_v13 = vrot.slane %v1607_v29, 3 }
 0x106   : > { %2818 = vmatprep.mubr.msk.bf16.mxu1 %vm2975_vm0, %v2974_v1 }
 0x107   : > { %v2588_v62 = vpop.f32.mrf.mxu1  ;;  %v490_v38 = vpop.f32.mrf.mxu0  ;;  %2775 = vmatmul.mubr.msk.bf16.gmra.mxu0 %vm380_vm1, %v3416_v39 }
 0x108   : > { %v3566_v63 = vadd.f32 %v625_v37, %v490_v38  ;;  %2778 = vmatprep.mubr.msk.bf16.mxu0 %vm2975_vm0, %v2974_v1 }
 0x109   : > { %v628_v48 = vpop.f32.mrf.mxu1  ;;  %v2548_v50 = vpop.f32.mrf.mxu0 }
 0x10b   : > { %v2589_v60 = vpop.f32.mrf.mxu1  ;;  %v493_v4 = vpop.f32.mrf.mxu0 }
 0x10c   : > { %v3574_v6 = vadd.f32 %v628_v48, %v493_v4  ;;  %v1601_v48 = vor.u32 %v1600_v49, %v1597_v16 }
 0x10d   : > { %v633_v55 = vpop.f32.mrf.mxu1  ;;  %2819 = vmatmul.mubr.msk.bf16.gmra.mxu1 %vm380_vm1, %v1585_v51  ;;  %v2549_v39 = vpop.f32.mrf.mxu0  ;;  %v1604_v51 = vshrl.u32 %v3599_v35, 16 }
 0x10e   : > { %2822 = vmatprep.mubr.msk.bf16.mxu1 %vm2975_vm0, %v2974_v1 }
 0x10f   : > { %v2592_v7 = vpop.f32.mrf.mxu1  ;;  %v498_v31 = vpop.f32.mrf.mxu0  ;;  %2779 = vmatmul.mubr.msk.bf16.gmra.mxu0 %vm380_vm1, %v3430_v57  ;;  %v1606_v9 = vrot.slane %v1604_v51, 2 }
 0x110   : > { %v3586_v61 = vadd.f32 %v633_v55, %v498_v31  ;;  %2782 = vmatprep.mubr.msk.bf16.mxu0 %vm2975_vm0, %v2974_v1  ;;  %v1602_v55 = vsel %vm1562_vm6, %v1592_v11, %v1601_v48 }
 0x111   : > { %v636_v18 = vpop.f32.mrf.mxu1  ;;  %v2552_v52 = vpop.f32.mrf.mxu0  ;;  %v1610_v31 = vor.u32 %v1609_v13, %v1606_v9 }
 0x113   : > { %v2593_v32 = vpop.f32.mrf.mxu1  ;;  %v501_v57 = vpop.f32.mrf.mxu0  ;;  %v1611_v56 = vsel %vm1562_vm6, %v1601_v48, %v1610_v31  ;;  %v1783_v31 = vrot.slane %v3109_v33, 3 }
 0x114   : > { %v3595_v17 = vadd.f32 %v636_v18, %v501_v57  ;;  %v1412_v18 = vrot.slane %v3577_v25, 2 }
 0x115   : > { %v641_v14 = vpop.f32.mrf.mxu1  ;;  %2823 = vmatmul.mubr.msk.bf16.gmra.mxu1 %vm380_vm1, %v1589_v27  ;;  %v2553_v21 = vpop.f32.mrf.mxu0 }
 0x116   : > { %2826 = vmatprep.mubr.msk.bf16.mxu1 %vm2975_vm0, %v2974_v1 }
 0x117   : > { %v2596_v20 = vpop.f32.mrf.mxu1  ;;  %v506_v37 = vpop.f32.mrf.mxu0  ;;  %2783 = vmatmul.mubr.msk.bf16.gmra.mxu0 %vm380_vm1, %v3444_v2 }
 0x118   : > { %v3603_v41 = vadd.f32 %v641_v14, %v506_v37  ;;  %2786 = vmatprep.mubr.msk.bf16.mxu0 %vm2975_vm0, %v2974_v1 }
 0x119   : > { %v644_v24 = vpop.f32.mrf.mxu1  ;;  %v2556_v62 = vpop.f32.mrf.mxu0 }
 0x11b   : > { %v2597_v3 = vpop.f32.mrf.mxu1  ;;  %v509_v54 = vpop.f32.mrf.mxu0 }
 0x11c   : > { %v3612_v38 = vadd.f32 %v644_v24, %v509_v54  ;;  %v2964_v54 = vld [vmem:[%s3041_s6 + $0x10] sm:$0xff]  }
 0x11d   : > { %v910_v26 = vpop.f32.mrf.mxu1  ;;  %2827 = vmatmul.mubr.msk.bf16.gmra.mxu1 %vm380_vm1, %v1593_v28  ;;  %v2557_v60 = vpop.f32.mrf.mxu0 }
 0x11e   : > { %2830 = vmatprep.mubr.msk.bf16.mxu1 %vm2975_vm0, %v2974_v1  ;;  %v1781_v60 = vrot.slane %v3076_v22, 3 }
 0x11f   : > { %v2644_v2 = vpop.f32.mrf.mxu1  ;;  %v756_v4 = vpop.f32.mrf.mxu0  ;;  %2787 = vmatmul.mubr.msk.bf16.gmra.mxu0 %vm380_vm1, %v3465_v44 }
 0x120   : > { %v827_v39 = vadd.f32 %v756_v4, %v3468_v15  ;;  %2790 = vmatprep.mubr.msk.bf16.mxu0 %vm2975_vm0, %v2974_v1  ;;  %v1413_v15 = vsel %vm1221_vm4, %v3456_v43, %v1412_v18  ;;  %v1780_v2 = vrot.slane %v2964_v54, 3  ;;  %v1787_v54 = vrot.slane %v3165_v53, 3 }
 0x121   : > { %v913_v50 = vpop.f32.mrf.mxu1  ;;  %v2604_v27 = vpop.f32.mrf.mxu0 }
 0x122   : > { %v3622_v10 = vadd.f32 %v910_v26, %v827_v39 }
 0x123   : > { %v2645_v7 = vpop.f32.mrf.mxu1  ;;  %v759_v32 = vpop.f32.mrf.mxu0 }
 0x124   : > { %v828_v52 = vadd.f32 %v759_v32, %v3479_v34  ;;  %v1414_v34 = vrot.slane %v3599_v35, 2  ;;  %v1782_v7 = vsel %vm1779_vm7, %v1780_v2, %v1781_v60 }
 0x125   : > { %v918_v40 = vpop.f32.mrf.mxu1  ;;  %2831 = vmatmul.mubr.msk.bf16.gmra.mxu1 %vm380_vm1, %v1602_v55  ;;  %v2605_v14 = vpop.f32.mrf.mxu0 }
 0x126   : > { %2834 = vmatprep.mubr.msk.bf16.mxu1 %vm2975_vm0, %v2974_v1  ;;  %v3629_v36 = vadd.f32 %v913_v50, %v828_v52 }
 0x127   : > { %v2648_v44 = vpop.f32.mrf.mxu1  ;;  %v764_v57 = vpop.f32.mrf.mxu0  ;;  %2791 = vmatmul.mubr.msk.bf16.gmra.mxu0 %vm380_vm1, %v1413_v15 }
 0x128   : > { %v829_v21 = vadd.f32 %v764_v57, %v3489_v0  ;;  %2794 = vmatprep.mubr.msk.bf16.mxu0 %vm2975_vm0, %v2974_v1  ;;  %v1415_v0 = vsel %vm1221_vm4, %v1412_v18, %v1414_v34 }
 0x129   : > { %v921_v11 = vpop.f32.mrf.mxu1  ;;  %v2608_v24 = vpop.f32.mrf.mxu0 }
 0x12a   : > { %v3638_v43 = vadd.f32 %v918_v40, %v829_v21 }
 0x12b   : > { %v2649_v20 = vpop.f32.mrf.mxu1  ;;  %v767_v16 = vpop.f32.mrf.mxu0 }
 0x12c   : > { %v830_v37 = vadd.f32 %v767_v16, %v3496_v8 }
 0x12d   : > { %v926_v28 = vpop.f32.mrf.mxu1  ;;  %2835 = vmatmul.mubr.msk.bf16.gmra.mxu1 %vm380_vm1, %v1611_v56  ;;  %v2609_v3 = vpop.f32.mrf.mxu0  ;;  %v2962_v56 = vld [vmem:[%s3969_s3 + $0x8] sm:$0xff]  }
 0x12e   : > { %2882 = vmatprep.mubr.msk.bf16.mxu1 %vm2975_vm0, %v2974_v1  ;;  %v3644_v26 = vadd.f32 %v921_v11, %v830_v37  ;;  %v1784_v11 = vsel %vm1779_vm7, %v1781_v60, %v1783_v31  ;;  %2879 = vmatpush3.bf16.msra.mxu1 %v2962_v56 }
 0x12f   : > { %v2652_v49 = vpop.f32.mrf.mxu1  ;;  %v772_v48 = vpop.f32.mrf.mxu0  ;;  %2795 = vmatmul.mubr.msk.bf16.gmra.mxu0 %vm380_vm1, %v1415_v0  ;;  %2880 = vmatprep.subr.bf16.mxu1 %v2974_v1 }
 0x130   : > { %v831_v29 = vadd.f32 %v772_v48, %v3503_v23  ;;  %2842 = vmatprep.mubr.msk.bf16.mxu0 %vm2975_vm0, %v2974_v1 }
 0x131   : > { %v929_v62 = vpop.f32.mrf.mxu1  ;;  %v2612_v8 = vpop.f32.mrf.mxu0 }
 0x132   : > { %v3652_v55 = vadd.f32 %v926_v28, %v831_v29 }
 0x133   : > { %v2653_v51 = vpop.f32.mrf.mxu1  ;;  %v775_v9 = vpop.f32.mrf.mxu0 }
 0x134   : > { %v832_v4 = vadd.f32 %v775_v9, %v3510_v42 }
 0x135   : > { %v934_v50 = vpop.f32.mrf.mxu1  ;;  %v2613_v39 = vpop.f32.mrf.mxu0 }
 0x136   : > { %v3656_v18 = vadd.f32 %v929_v62, %v832_v4 }
 0x137   : > { %v2656_v13 = vpop.f32.mrf.mxu1  ;;  %v780_v27 = vpop.f32.mrf.mxu0  ;;  %2843 = vmatmul.mubr.msk.bf16.vlgmr.msra.gmra.mxu0 %vm380_vm1, %v1782_v7 }
 0x138   : > { %v833_v22 = vadd.f32 %v780_v27, %v3520_v58  ;;  %2846 = vmatprep.mubr.msk.bf16.mxu0 %vm2975_vm0, %v2974_v1  ;;  %v1789_v27 = vrot.slane %v3184_v59, 3 }
 0x139   : > { %v937_v23 = vpop.f32.mrf.mxu1  ;;  %v2616_v32 = vpop.f32.mrf.mxu0 }
 0x13a   : > { %v3663_v42 = vadd.f32 %v934_v50, %v833_v22 }
 0x13b   : > { %v2657_v40 = vpop.f32.mrf.mxu1  ;;  %v783_v52 = vpop.f32.mrf.mxu0 }
 0x13c   : > { %v834_v14 = vadd.f32 %v783_v52, %v3531_v5  ;;  %v1785_v5 = vrot.slane %v3146_v47, 3  ;;  %v1790_v52 = vsel %vm1779_vm7, %v1787_v54, %v1789_v27 }
 0x13d   : > { %v942_v44 = vpop.f32.mrf.mxu1  ;;  %v2617_v58 = vpop.f32.mrf.mxu0 }
 0x13e   : > { %v3670_v20 = vadd.f32 %v937_v23, %v834_v14  ;;  %v1786_v3 = vsel %vm1779_vm7, %v1783_v31, %v1785_v5  ;;  %v1788_v13 = vsel %vm1779_vm7, %v1785_v5, %v1787_v54  ;;  %v2965_v58 = vld [vmem:[%s3041_s6 + $0x40] sm:$0xff]  }
 0x13f   : > { %v2660_v15 = vpop.f32.mrf.mxu1  ;;  %v788_v33 = vpop.f32.mrf.mxu0  ;;  %2847 = vmatmul.mubr.msk.bf16.gmra.mxu0 %vm380_vm1, %v1784_v11 }
 0x140   : > { %v835_v34 = vadd.f32 %v788_v33, %v3538_v12  ;;  %2850 = vmatprep.mubr.msk.bf16.mxu0 %vm2975_vm0, %v2974_v1 }
 0x141   : > { %v945_v57 = vpop.f32.mrf.mxu1  ;;  %v2620_v24 = vpop.f32.mrf.mxu0 }
 0x142   : > { %v3678_v16 = vadd.f32 %v942_v44, %v835_v34 }
 0x143   : > { %v2661_v21 = vpop.f32.mrf.mxu1  ;;  %v791_v49 = vpop.f32.mrf.mxu0 }
 0x144   : > { %v836_v0 = vadd.f32 %v791_v49, %v3545_v19 }
 0x145   : > { %v950_v28 = vpop.f32.mrf.mxu1  ;;  %v2621_v62 = vpop.f32.mrf.mxu0 }
 0x146   : > { %v3682_v51 = vadd.f32 %v945_v57, %v836_v0  ;;  %v1791_v57 = vrot.slane %v2965_v58, 3 }
 0x147   : > { %v2664_v37 = vpop.f32.mrf.mxu1  ;;  %v796_v12 = vpop.f32.mrf.mxu0  ;;  %2851 = vmatmul.mubr.msk.bf16.gmra.mxu0 %vm380_vm1, %v1786_v3 }
 0x148   : > { %v837_v47 = vadd.f32 %v796_v12, %v3552_v30  ;;  %2854 = vmatprep.mubr.msk.bf16.mxu0 %vm2975_vm0, %v2974_v1 }
 0x149   : > { %v953_v48 = vpop.f32.mrf.mxu1  ;;  %v2624_v2 = vpop.f32.mrf.mxu0 }
 0x14a   : > { %v3689_v19 = vadd.f32 %v950_v28, %v837_v47  ;;  %v1792_v28 = vsel %vm1779_vm7, %v1789_v27, %v1791_v57 }
 0x14b   : > { %v2665_v29 = vpop.f32.mrf.mxu1  ;;  %v799_v8 = vpop.f32.mrf.mxu0 }
 0x14c   : > { %v838_v9 = vadd.f32 %v799_v8, %v3559_v45 }
 0x14d   : > { %v958_v60 = vpop.f32.mrf.mxu1  ;;  %v2625_v4 = vpop.f32.mrf.mxu0 }
 0x14e   : > { %v3693_v39 = vadd.f32 %v953_v48, %v838_v9  ;;  %v1793_v48 = vrot.slane %v3304_v46, 3 }
 0x14f   : > { %v2668_v50 = vpop.f32.mrf.mxu1  ;;  %v804_v30 = vpop.f32.mrf.mxu0  ;;  %2855 = vmatmul.mubr.msk.bf16.gmra.mxu0 %vm380_vm1, %v1788_v13 }
 0x150   : > { %v839_v53 = vadd.f32 %v804_v30, %v3566_v63  ;;  %2858 = vmatprep.mubr.msk.bf16.mxu0 %vm2975_vm0, %v2974_v1 }
 0x151   : > { %v961_v7 = vpop.f32.mrf.mxu1  ;;  %v2628_v40 = vpop.f32.mrf.mxu0 }
 0x152   : > { %v3700_v22 = vadd.f32 %v958_v60, %v839_v53 }
 0x153   : > { %v2669_v23 = vpop.f32.mrf.mxu1  ;;  %v807_v31 = vpop.f32.mrf.mxu0 }
 0x154   : > { %v840_v44 = vadd.f32 %v807_v31, %v3574_v6 }
 0x155   : > { %v966_v45 = vpop.f32.mrf.mxu1  ;;  %v2629_v15 = vpop.f32.mrf.mxu0 }
 0x156   : > { %v3704_v11 = vadd.f32 %v961_v7, %v840_v44  ;;  %v1795_v7 = vrot.slane %v3577_v25, 3  ;;  %v1797_v15 = vrot.slane %v3599_v35, 3 }
 0x157   : > { %v2672_v32 = vpop.f32.mrf.mxu1  ;;  %v812_v63 = vpop.f32.mrf.mxu0  ;;  %2859 = vmatmul.mubr.msk.bf16.gmra.mxu0 %vm380_vm1, %v1790_v52 }
 0x158   : > { %v841_v59 = vadd.f32 %v812_v63, %v3586_v61  ;;  %2862 = vmatprep.mubr.msk.bf16.mxu0 %vm2975_vm0, %v2974_v1 }
 0x159   : > { %v969_v14 = vpop.f32.mrf.mxu1  ;;  %v2632_v33 = vpop.f32.mrf.mxu0 }
 0x15a   : > { %v3711_v6 = vadd.f32 %v966_v45, %v841_v59  ;;  %v1796_v45 = vsel %vm1779_vm7, %v1793_v48, %v1795_v7 }
 0x15b   : > { %v2673_v56 = vpop.f32.mrf.mxu1  ;;  %v815_v34 = vpop.f32.mrf.mxu0 }
 0x15c   : > { %v842_v24 = vadd.f32 %v815_v34, %v3595_v17  ;;  %v2963_v17 = vld [vmem:[%s3969_s3] sm:$0xff]  }
 0x15d   : > { %v974_v21 = vpop.f32.mrf.mxu1  ;;  %v2633_v49 = vpop.f32.mrf.mxu0  ;;  %2881 = vmatpush3.bf16.msra.mxu1 %v2963_v17 }
 0x15e   : > { %v3715_v0 = vadd.f32 %v969_v14, %v842_v24 }
 0x15f   : > { %v2676_v5 = vpop.f32.mrf.mxu1  ;;  %v820_v61 = vpop.f32.mrf.mxu0  ;;  %2863 = vmatmul.mubr.msk.bf16.gmra.mxu0 %vm380_vm1, %v1792_v28 }
 0x160   : > { %v843_v62 = vadd.f32 %v820_v61, %v3603_v41  ;;  %2866 = vmatprep.mubr.msk.bf16.mxu0 %vm2975_vm0, %v2974_v1  ;;  %v1794_v41 = vsel %vm1779_vm7, %v1791_v57, %v1793_v48  ;;  %v1798_v57 = vsel %vm1779_vm7, %v1795_v7, %v1797_v15 }
 0x161   : > { %v977_v37 = vpop.f32.mrf.mxu1  ;;  %v2636_v12 = vpop.f32.mrf.mxu0 }
 0x162   : > { %v3725_v47 = vadd.f32 %v974_v21, %v843_v62 }
 0x163   : > { %v2677_v3 = vpop.f32.mrf.mxu1  ;;  %v823_v54 = vpop.f32.mrf.mxu0 }
 0x164   : > { %v844_v60 = vadd.f32 %v823_v54, %v3612_v38 }
 0x165   : > { %v1314_v29 = vpop.f32.mrf.mxu1  ;;  %v2637_v8 = vpop.f32.mrf.mxu0 }
 0x166   : > { %v3729_v9 = vadd.f32 %v977_v37, %v844_v60 }
 0x167   : > { %v2724_v2 = vpop.f32.mrf.mxu1  ;;  %v1127_v46 = vpop.f32.mrf.mxu0  ;;  %2867 = vmatmul.mubr.msk.bf16.gmra.mxu0 %vm380_vm1, %v1794_v41 }
 0x168   : > { %v1198_v4 = vadd.f32 %v1127_v46, %v3622_v10  ;;  %2870 = vmatprep.mubr.msk.bf16.mxu0 %vm2975_vm0, %v2974_v1 }
 0x169   : > { %v1317_v50 = vpop.f32.mrf.mxu1  ;;  %v2684_v30 = vpop.f32.mrf.mxu0 }
 0x16a   : > { %v3736_v38 = vadd.f32 %v1314_v29, %v1198_v4 }
 0x16b   : > { %v2725_v13 = vpop.f32.mrf.mxu1  ;;  %v1130_v53 = vpop.f32.mrf.mxu0 }
 0x16c   : > { %v1199_v40 = vadd.f32 %v1130_v53, %v3629_v36 }
 0x16d   : > { %v1322_v23 = vpop.f32.mrf.mxu1  ;;  %v2685_v31 = vpop.f32.mrf.mxu0 }
 0x16e   : > { %v3740_v44 = vadd.f32 %v1317_v50, %v1199_v40 }
 0x16f   : > { %v2728_v27 = vpop.f32.mrf.mxu1  ;;  %v1135_v10 = vpop.f32.mrf.mxu0  ;;  %2871 = vmatmul.mubr.msk.bf16.gmra.mxu0 %vm380_vm1, %v1796_v45 }
 0x170   : > { %v1200_v25 = vadd.f32 %v1135_v10, %v3638_v43  ;;  %2874 = vmatprep.mubr.msk.bf16.mxu0 %vm2975_vm0, %v2974_v1 }
 0x171   : > { %v1325_v32 = vpop.f32.mrf.mxu1  ;;  %v2688_v14 = vpop.f32.mrf.mxu0 }
 0x172   : > { %v3747_v36 = vadd.f32 %v1322_v23, %v1200_v25 }
 0x173   : > { %v2729_v52 = vpop.f32.mrf.mxu1  ;;  %v1138_v56 = vpop.f32.mrf.mxu0 }
 0x174   : > { %v1201_v58 = vadd.f32 %v1138_v56, %v3644_v26 }
 0x175   : > { %v1330_v63 = vpop.f32.mrf.mxu1  ;;  %v2689_v33 = vpop.f32.mrf.mxu0 }
 0x176   : > { %v3751_v34 = vadd.f32 %v1325_v32, %v1201_v58 }
 0x177   : > { %v2732_v59 = vpop.f32.mrf.mxu1  ;;  %v1143_v43 = vpop.f32.mrf.mxu0  ;;  %2875 = vmatmul.mubr.msk.bf16.gmra.mxu0 %vm380_vm1, %v1798_v57 }
 0x178   : > { %v1202_v35 = vadd.f32 %v1143_v43, %v3652_v55 }
 0x179   : > { %v1333_v21 = vpop.f32.mrf.mxu1  ;;  %v2692_v24 = vpop.f32.mrf.mxu0 }
 0x17a   : > { %v3755_v49 = vadd.f32 %v1330_v63, %v1202_v35 }
 0x17b   : > { %v2733_v5 = vpop.f32.mrf.mxu1  ;;  %v1146_v37 = vpop.f32.mrf.mxu0 }
 0x17c   : > { %v1203_v26 = vadd.f32 %v1146_v37, %v3656_v18 }
 0x17d   : > { %v1338_v28 = vpop.f32.mrf.mxu1  ;;  %v2693_v3 = vpop.f32.mrf.mxu0 }
 0x17e   : > { %v3758_v48 = vadd.f32 %v1333_v21, %v1203_v26 }
 0x17f   : > { %v2736_v61 = vpop.f32.mrf.mxu1  ;;  %v1151_v17 = vpop.f32.mrf.mxu0 }
 0x180   : > { %v1204_v29 = vadd.f32 %v1151_v17, %v3663_v42 }
 0x181   : > { %v1341_v62 = vpop.f32.mrf.mxu1  ;;  %v2696_v54 = vpop.f32.mrf.mxu0 }
 0x182   : > { %v3761_v60 = vadd.f32 %v1338_v28, %v1204_v29 }
 0x183   : > { %v2737_v12 = vpop.f32.mrf.mxu1  ;;  %v1154_v55 = vpop.f32.mrf.mxu0 }
 0x184   : > { %v1205_v8 = vadd.f32 %v1154_v55, %v3670_v20 }
 0x185   : > { %v1346_v2 = vpop.f32.mrf.mxu1  ;;  %v2697_v50 = vpop.f32.mrf.mxu0 }
 0x186   : > { %v3764_v13 = vadd.f32 %v1341_v62, %v1205_v8 }
 0x187   : > { %v2740_v41 = vpop.f32.mrf.mxu1  ;;  %v1159_v18 = vpop.f32.mrf.mxu0 }
 0x188   : > { %v1206_v7 = vadd.f32 %v1159_v18, %v3678_v16 }
 0x189   : > { %v1349_v46 = vpop.f32.mrf.mxu1  ;;  %v2700_v30 = vpop.f32.mrf.mxu0 }
 0x18a   : > { %v3767_v53 = vadd.f32 %v1346_v2, %v1206_v7 }
 0x18b   : > { %v2741_v4 = vpop.f32.mrf.mxu1  ;;  %v1162_v42 = vpop.f32.mrf.mxu0 }
 0x18c   : > { %v1207_v40 = vadd.f32 %v1162_v42, %v3682_v51 }
 0x18d   : > { %v1354_v23 = vpop.f32.mrf.mxu1  ;;  %v2701_v45 = vpop.f32.mrf.mxu0 }
 0x18e   : > { %v3770_v32 = vadd.f32 %v1349_v46, %v1207_v40 }
 0x18f   : > { %v2744_v27 = vpop.f32.mrf.mxu1  ;;  %v1167_v20 = vpop.f32.mrf.mxu0 }
 0x190   : > { %v1208_v52 = vadd.f32 %v1167_v20, %v3689_v19 }
 0x191   : > { %v1357_v31 = vpop.f32.mrf.mxu1  ;;  %v2704_v25 = vpop.f32.mrf.mxu0 }
 0x192   : > { %v3773_v14 = vadd.f32 %v1354_v23, %v1208_v52 }
 0x193   : > { %v2745_v10 = vpop.f32.mrf.mxu1  ;;  %v1170_v16 = vpop.f32.mrf.mxu0 }
 0x194   : > { %v1209_v56 = vadd.f32 %v1170_v16, %v3693_v39 }
 0x195   : > { %v1362_v15 = vpop.f32.mrf.mxu1  ;;  %v2705_v59 = vpop.f32.mrf.mxu0 }
 0x196   : > { %v3776_v57 = vadd.f32 %v1357_v31, %v1209_v56 }
 0x197   : > { %v2748_v63 = vpop.f32.mrf.mxu1  ;;  %v1175_v51 = vpop.f32.mrf.mxu0 }
 0x198   : > { %v1210_v21 = vadd.f32 %v1175_v51, %v3700_v22 }
 0x199   : > { %v1365_v58 = vpop.f32.mrf.mxu1  ;;  %v2708_v43 = vpop.f32.mrf.mxu0 }
 0x19a   : > { %v3779_v35 = vadd.f32 %v1362_v15, %v1210_v21 }
 0x19b   : > { %v2749_v33 = vpop.f32.mrf.mxu1  ;;  %v1178_v19 = vpop.f32.mrf.mxu0 }
 0x19c   : > { %v1211_v28 = vadd.f32 %v1178_v19, %v3704_v11 }
 0x19d   : > { %v1370_v5 = vpop.f32.mrf.mxu1  ;;  %v2709_v37 = vpop.f32.mrf.mxu0 }
 0x19e   : > { %v3782_v26 = vadd.f32 %v1365_v58, %v1211_v28 }
 0x19f   : > { %v2752_v24 = vpop.f32.mrf.mxu1  ;;  %v1183_v39 = vpop.f32.mrf.mxu0 }
 0x1a0   : > { %v1212_v62 = vadd.f32 %v1183_v39, %v3711_v6 }
 0x1a1   : > { %v1373_v61 = vpop.f32.mrf.mxu1  ;;  %v2712_v17 = vpop.f32.mrf.mxu0 }
 0x1a2   : > { %v3785_v29 = vadd.f32 %v1370_v5, %v1212_v62 }
 0x1a3   : > { %v2753_v3 = vpop.f32.mrf.mxu1  ;;  %v1186_v22 = vpop.f32.mrf.mxu0 }
 0x1a4   : > { %v1213_v2 = vadd.f32 %v1186_v22, %v3715_v0 }
 0x1a5   : > { %v1378_v12 = vpop.f32.mrf.mxu1  ;;  %v2713_v55 = vpop.f32.mrf.mxu0 }
 0x1a6   : > { %v3788_v8 = vadd.f32 %v1373_v61, %v1213_v2 }
 0x1a7   : > { %v2756_v54 = vpop.f32.mrf.mxu1  ;;  %v1191_v11 = vpop.f32.mrf.mxu0 }
 0x1a8   : > { %v1214_v46 = vadd.f32 %v1191_v11, %v3725_v47 }
 0x1a9   : > { %v1381_v41 = vpop.f32.mrf.mxu1  ;;  %v2716_v18 = vpop.f32.mrf.mxu0 }
 0x1aa   : > { %v3791_v7 = vadd.f32 %v1378_v12, %v1214_v46 }
 0x1ab   : > { %v2757_v50 = vpop.f32.mrf.mxu1  ;;  %v1194_v6 = vpop.f32.mrf.mxu0 }
 0x1ac   : > { %v1215_v23 = vadd.f32 %v1194_v6, %v3729_v9 }
 0x1ad   : > { %v1685_v4 = vpop.f32.mrf.mxu1  ;;  %v2717_v42 = vpop.f32.mrf.mxu0 }
 0x1ae   : > { %v3794_v40 = vadd.f32 %v1381_v41, %v1215_v23 }
 0x1af   : > { %v2804_v30 = vpop.f32.mrf.mxu1  ;;  %v1468_v0 = vpop.f32.mrf.mxu0 }
 0x1b0   : > { %v1539_v31 = vadd.f32 %v1468_v0, %v3736_v38 }
 0x1b1   : > { %v1688_v27 = vpop.f32.mrf.mxu1  ;;  %v2764_v20 = vpop.f32.mrf.mxu0 }
 0x1b2   : > { %v3797_v52 = vadd.f32 %v1685_v4, %v1539_v31 }
 0x1b3   : > { %v2805_v45 = vpop.f32.mrf.mxu1  ;;  %v1471_v47 = vpop.f32.mrf.mxu0 }
 0x1b4   : > { %v1540_v15 = vadd.f32 %v1471_v47, %v3740_v44 }
 0x1b5   : > { %v1693_v10 = vpop.f32.mrf.mxu1  ;;  %v2765_v16 = vpop.f32.mrf.mxu0 }
 0x1b6   : > { %v3800_v56 = vadd.f32 %v1688_v27, %v1540_v15 }
 0x1b7   : > { %v2808_v25 = vpop.f32.mrf.mxu1  ;;  %v1476_v9 = vpop.f32.mrf.mxu0 }
 0x1b8   : > { %v1541_v58 = vadd.f32 %v1476_v9, %v3747_v36 }
 0x1b9   : > { %v1696_v63 = vpop.f32.mrf.mxu1  ;;  %v2768_v51 = vpop.f32.mrf.mxu0 }
 0x1ba   : > { %v3803_v21 = vadd.f32 %v1693_v10, %v1541_v58 }
 0x1bb   : > { %v2809_v59 = vpop.f32.mrf.mxu1  ;;  %v1479_v38 = vpop.f32.mrf.mxu0 }
 0x1bc   : > { %v1542_v5 = vadd.f32 %v1479_v38, %v3751_v34 }
 0x1bd   : > { %v1701_v33 = vpop.f32.mrf.mxu1  ;;  %v2769_v19 = vpop.f32.mrf.mxu0 }
 0x1be   : > { %v3806_v28 = vadd.f32 %v1696_v63, %v1542_v5 }
 0x1bf   : > { %v2812_v43 = vpop.f32.mrf.mxu1  ;;  %v1484_v44 = vpop.f32.mrf.mxu0 }
 0x1c0   : > { %v1543_v61 = vadd.f32 %v1484_v44, %v3755_v49 }
 0x1c1   : > { %v1704_v24 = vpop.f32.mrf.mxu1  ;;  %v2772_v39 = vpop.f32.mrf.mxu0 }
 0x1c2   : > { %v3809_v62 = vadd.f32 %v1701_v33, %v1543_v61 }
 0x1c3   : > { %v2813_v37 = vpop.f32.mrf.mxu1  ;;  %v1487_v36 = vpop.f32.mrf.mxu0 }
 0x1c4   : > { %v1544_v12 = vadd.f32 %v1487_v36, %v3758_v48 }
 0x1c5   : > { %v1709_v3 = vpop.f32.mrf.mxu1  ;;  %v2773_v22 = vpop.f32.mrf.mxu0 }
 0x1c6   : > { %v3812_v2 = vadd.f32 %v1704_v24, %v1544_v12 }
 0x1c7   : > { %v2816_v17 = vpop.f32.mrf.mxu1  ;;  %v1492_v34 = vpop.f32.mrf.mxu0 }
 0x1c8   : > { %v1545_v41 = vadd.f32 %v1492_v34, %v3761_v60 }
 0x1c9   : > { %v1712_v54 = vpop.f32.mrf.mxu1  ;;  %v2776_v11 = vpop.f32.mrf.mxu0 }
 0x1ca   : > { %v3815_v46 = vadd.f32 %v1709_v3, %v1545_v41 }
 0x1cb   : > { %v2817_v55 = vpop.f32.mrf.mxu1  ;;  %v1495_v49 = vpop.f32.mrf.mxu0 }
 0x1cc   : > { %v1546_v4 = vadd.f32 %v1495_v49, %v3764_v13 }
 0x1cd   : > { %v1717_v50 = vpop.f32.mrf.mxu1  ;;  %v2777_v6 = vpop.f32.mrf.mxu0 }
 0x1ce   : > { %v3818_v23 = vadd.f32 %v1712_v54, %v1546_v4 }
 0x1cf   : > { %v2820_v18 = vpop.f32.mrf.mxu1  ;;  %v1500_v48 = vpop.f32.mrf.mxu0 }
 0x1d0   : > { %v1547_v27 = vadd.f32 %v1500_v48, %v3767_v53 }
 0x1d1   : > { %v1720_v30 = vpop.f32.mrf.mxu1  ;;  %v2780_v0 = vpop.f32.mrf.mxu0 }
 0x1d2   : > { %v3821_v31 = vadd.f32 %v1717_v50, %v1547_v27 }
 0x1d3   : > { %v2821_v42 = vpop.f32.mrf.mxu1  ;;  %v1503_v60 = vpop.f32.mrf.mxu0 }
 0x1d4   : > { %v1548_v10 = vadd.f32 %v1503_v60, %v3770_v32 }
 0x1d5   : > { %v1725_v45 = vpop.f32.mrf.mxu1  ;;  %v2781_v47 = vpop.f32.mrf.mxu0 }
 0x1d6   : > { %v3824_v15 = vadd.f32 %v1720_v30, %v1548_v10 }
 0x1d7   : > { %v2824_v20 = vpop.f32.mrf.mxu1  ;;  %v1508_v13 = vpop.f32.mrf.mxu0 }
 0x1d8   : > { %v1549_v63 = vadd.f32 %v1508_v13, %v3773_v14  ;;  %v3854_v20 = vld [vmem:[%s3968_s2] ss:$0 sm:$0xff] }
 0x1d9   : > { %v1728_v25 = vpop.f32.mrf.mxu1  ;;  %v2784_v9 = vpop.f32.mrf.mxu0 }
 0x1da   : > { %v3827_v58 = vadd.f32 %v1725_v45, %v1549_v63 }
 0x1db   : > { %v2825_v16 = vpop.f32.mrf.mxu1  ;;  %v1511_v53 = vpop.f32.mrf.mxu0 }
 0x1dc   : > { %v1550_v33 = vadd.f32 %v1511_v53, %v3776_v57 }
 0x1dd   : > { %v1733_v59 = vpop.f32.mrf.mxu1  ;;  %v2785_v38 = vpop.f32.mrf.mxu0 }
 0x1de   : > { %v3830_v5 = vadd.f32 %v1728_v25, %v1550_v33 }
 0x1df   : > { %v2828_v51 = vpop.f32.mrf.mxu1  ;;  %v1516_v32 = vpop.f32.mrf.mxu0 }
 0x1e0   : > { %v1551_v24 = vadd.f32 %v1516_v32, %v3779_v35 }
 0x1e1   : > { %v1736_v43 = vpop.f32.mrf.mxu1  ;;  %v2788_v44 = vpop.f32.mrf.mxu0 }
 0x1e2   : > { %v3833_v61 = vadd.f32 %v1733_v59, %v1551_v24 }
 0x1e3   : > { %v2829_v19 = vpop.f32.mrf.mxu1  ;;  %v1519_v14 = vpop.f32.mrf.mxu0 }
 0x1e4   : > { %v1552_v3 = vadd.f32 %v1519_v14, %v3782_v26 }
 0x1e5   : > { %v1741_v37 = vpop.f32.mrf.mxu1  ;;  %v2789_v36 = vpop.f32.mrf.mxu0 }
 0x1e6   : > { %v3836_v12 = vadd.f32 %v1736_v43, %v1552_v3 }
 0x1e7   : > { %v2832_v39 = vpop.f32.mrf.mxu1  ;;  %v1524_v57 = vpop.f32.mrf.mxu0 }
 0x1e8   : > { %v1553_v54 = vadd.f32 %v1524_v57, %v3785_v29 }
 0x1e9   : > { %v1744_v17 = vpop.f32.mrf.mxu1  ;;  %v2792_v34 = vpop.f32.mrf.mxu0 }
 0x1ea   : > { %v3839_v41 = vadd.f32 %v1741_v37, %v1553_v54 }
 0x1eb   : > { %v2833_v22 = vpop.f32.mrf.mxu1  ;;  %v1527_v35 = vpop.f32.mrf.mxu0 }
 0x1ec   : > { %v1554_v50 = vadd.f32 %v1527_v35, %v3788_v8 }
 0x1ed   : > { %v1749_v55 = vpop.f32.mrf.mxu1  ;;  %v2793_v49 = vpop.f32.mrf.mxu0 }
 0x1ee   : > { %v3842_v4 = vadd.f32 %v1744_v17, %v1554_v50 }
 0x1ef   : > { %v2836_v11 = vpop.f32.mrf.mxu1  ;;  %v1532_v26 = vpop.f32.mrf.mxu0 }
 0x1f0   : > { %v1555_v30 = vadd.f32 %v1532_v26, %v3791_v7 }
 0x1f1   : > { %v1752_v18 = vpop.f32.mrf.mxu1  ;;  %v2796_v48 = vpop.f32.mrf.mxu0 }
 0x1f2   : > { %v3845_v42 = vadd.f32 %v1749_v55, %v1555_v30 }
 0x1f3   : > { %v2837_v6 = vpop.f32.mrf.mxu1  ;;  %v1535_v29 = vpop.f32.mrf.mxu0 }
 0x1f4   : > { %v1556_v27 = vadd.f32 %v1535_v29, %v3794_v40 }
 0x1f5   : > { %v2797_v0 = vpop.f32.mrf.mxu0 }
 0x1f6   : > { %v3848_v45 = vadd.f32 %v1752_v18, %v1556_v27 }
 0x1f7   : > { %v1872_v60 = vpop.f32.mrf.mxu0 }
 0x1f8   : > { %v1943_v8 = vadd.f32 %v1872_v60, %v3797_v52 }
 0x1f9   : > { %v2844_v10 = vpop.f32.mrf.mxu0 }
 0x1fa   : > { %v1968_v7 = vadd.f32 %v3854_v20, %v1943_v8 }
 0x1fb   : > { %v1875_v47 = vpop.f32.mrf.mxu0 }
 0x1fc   : > { %v1944_v25 = vadd.f32 %v1875_v47, %v3800_v56  ;;  %v1986_v63 = vmax.f32 %v1968_v7, 0.0 }
 0x1fd   : > { %v2845_v13 = vpop.f32.mrf.mxu0 }
 0x1fe   : > { %v1969_v40 = vadd.f32 %v3854_v20, %v1944_v25 }
 0x1ff   : > { %v1880_v16 = vpop.f32.mrf.mxu0 }
 0x200   : > { %v1987_v9 = vmax.f32 %v1969_v40, 0.0  ;;  %v1945_v59 = vadd.f32 %v1880_v16, %v3803_v21 }
 0x201   : > { %v2848_v52 = vpop.f32.mrf.mxu0 }
 0x202   : > { %v2004_v53 = vpack.c.bf16 %v1987_v9, %v1986_v63  ;;  %v1970_v33 = vadd.f32 %v3854_v20, %v1945_v59 }
 0x203   : > { %v1883_v51 = vpop.f32.mrf.mxu0 }
 0x204   : > { %v1946_v38 = vadd.f32 %v1883_v51, %v3806_v28  ;;  %2883 = vmatmul.mubr.msk.bf16.vlgmr.msra.gmra.mxu1 %vm380_vm1, %v2004_v53  ;;  %v1988_v19 = vmax.f32 %v1970_v33, 0.0 }
 0x205   : > { %v2849_v43 = vpop.f32.mrf.mxu0  ;;  %2886 = vmatprep.mubr.msk.bf16.mxu1 %vm2975_vm0, %v2974_v1 }
 0x206   : > { %v1971_v56 = vadd.f32 %v3854_v20, %v1946_v38 }
 0x207   : > { %v1888_v32 = vpop.f32.mrf.mxu0 }
 0x208   : > { %v1989_v24 = vmax.f32 %v1971_v56, 0.0  ;;  %v1947_v21 = vadd.f32 %v1888_v32, %v3809_v62 }
 0x209   : > { %v2852_v44 = vpop.f32.mrf.mxu0 }
 0x20a   : > { %v2005_v37 = vpack.c.bf16 %v1989_v24, %v1988_v19  ;;  %v1972_v39 = vadd.f32 %v3854_v20, %v1947_v21 }
 0x20b   : > { %v1891_v14 = vpop.f32.mrf.mxu0 }
 0x20c   : > { %v1948_v28 = vadd.f32 %v1891_v14, %v3812_v2  ;;  %2887 = vmatmul.mubr.msk.bf16.gmra.mxu1 %vm380_vm1, %v2005_v37  ;;  %v1990_v57 = vmax.f32 %v1972_v39, 0.0 }
 0x20d   : > { %v2853_v3 = vpop.f32.mrf.mxu0  ;;  %2890 = vmatprep.mubr.msk.bf16.mxu1 %vm2975_vm0, %v2974_v1 }
 0x20e   : > { %v1973_v36 = vadd.f32 %v3854_v20, %v1948_v28 }
 0x20f   : > { %v1896_v17 = vpop.f32.mrf.mxu0 }
 0x210   : > { %v1991_v22 = vmax.f32 %v1973_v36, 0.0  ;;  %v1949_v62 = vadd.f32 %v1896_v17, %v3815_v46 }
 0x211   : > { %v2856_v54 = vpop.f32.mrf.mxu0 }
 0x212   : > { %v2006_v34 = vpack.c.bf16 %v1991_v22, %v1990_v57  ;;  %v1974_v35 = vadd.f32 %v3854_v20, %v1949_v62 }
 0x213   : > { %v1899_v55 = vpop.f32.mrf.mxu0 }
 0x214   : > { %v1950_v2 = vadd.f32 %v1899_v55, %v3818_v23  ;;  %2891 = vmatmul.mubr.msk.bf16.gmra.mxu1 %vm380_vm1, %v2006_v34  ;;  %v1992_v18 = vmax.f32 %v1974_v35, 0.0 }
 0x215   : > { %v2857_v11 = vpop.f32.mrf.mxu0  ;;  %2894 = vmatprep.mubr.msk.bf16.mxu1 %vm2975_vm0, %v2974_v1 }
 0x216   : > { %v1975_v50 = vadd.f32 %v3854_v20, %v1950_v2 }
 0x217   : > { %v1904_v49 = vpop.f32.mrf.mxu0 }
 0x218   : > { %v1993_v26 = vmax.f32 %v1975_v50, 0.0  ;;  %v1951_v46 = vadd.f32 %v1904_v49, %v3821_v31 }
 0x219   : > { %v2860_v6 = vpop.f32.mrf.mxu0 }
 0x21a   : > { %v2007_v30 = vpack.c.bf16 %v1993_v26, %v1992_v18  ;;  %v1976_v29 = vadd.f32 %v3854_v20, %v1951_v46 }
 0x21b   : > { %v1907_v48 = vpop.f32.mrf.mxu0 }
 0x21c   : > { %v1952_v23 = vadd.f32 %v1907_v48, %v3824_v15  ;;  %2895 = vmatmul.mubr.msk.bf16.gmra.mxu1 %vm380_vm1, %v2007_v30  ;;  %v1994_v8 = vmax.f32 %v1976_v29, 0.0 }
 0x21d   : > { %v2861_v27 = vpop.f32.mrf.mxu0  ;;  %2898 = vmatprep.mubr.msk.bf16.mxu1 %vm2975_vm0, %v2974_v1 }
 0x21e   : > { %v1977_v0 = vadd.f32 %v3854_v20, %v1952_v23 }
 0x21f   : > { %v1912_v60 = vpop.f32.mrf.mxu0 }
 0x220   : > { %v1995_v10 = vmax.f32 %v1977_v0, 0.0  ;;  %v1953_v31 = vadd.f32 %v1912_v60, %v3827_v58 }
 0x221   : > { %v2864_v47 = vpop.f32.mrf.mxu0 }
 0x222   : > { %v2008_v7 = vpack.c.bf16 %v1995_v10, %v1994_v8  ;;  %v1978_v13 = vadd.f32 %v3854_v20, %v1953_v31 }
 0x223   : > { %v1915_v25 = vpop.f32.mrf.mxu0 }
 0x224   : > { %v1954_v15 = vadd.f32 %v1915_v25, %v3830_v5  ;;  %2899 = vmatmul.mubr.msk.bf16.gmra.mxu1 %vm380_vm1, %v2008_v7  ;;  %v1996_v9 = vmax.f32 %v1978_v13, 0.0 }
 0x225   : > { %v2865_v40 = vpop.f32.mrf.mxu0  ;;  %2902 = vmatprep.mubr.msk.bf16.mxu1 %vm2975_vm0, %v2974_v1 }
 0x226   : > { %v1979_v16 = vadd.f32 %v3854_v20, %v1954_v15 }
 0x227   : > { %v1920_v63 = vpop.f32.mrf.mxu0 }
 0x228   : > { %v1997_v59 = vmax.f32 %v1979_v16, 0.0  ;;  %v1955_v58 = vadd.f32 %v1920_v63, %v3833_v61 }
 0x229   : > { %v2868_v52 = vpop.f32.mrf.mxu0 }
 0x22a   : > { %v2009_v53 = vpack.c.bf16 %v1997_v59, %v1996_v9  ;;  %v1980_v33 = vadd.f32 %v3854_v20, %v1955_v58 }
 0x22b   : > { %v1923_v51 = vpop.f32.mrf.mxu0 }
 0x22c   : > { %v1956_v5 = vadd.f32 %v1923_v51, %v3836_v12  ;;  %2903 = vmatmul.mubr.msk.bf16.gmra.mxu1 %vm380_vm1, %v2009_v53  ;;  %v1998_v32 = vmax.f32 %v1980_v33, 0.0 }
 0x22d   : > { %v2869_v38 = vpop.f32.mrf.mxu0  ;;  %2906 = vmatprep.mubr.msk.bf16.mxu1 %vm2975_vm0, %v2974_v1 }
 0x22e   : > { %v1981_v43 = vadd.f32 %v3854_v20, %v1956_v5 }
 0x22f   : > { %v1928_v56 = vpop.f32.mrf.mxu0 }
 0x230   : > { %v1999_v19 = vmax.f32 %v1981_v43, 0.0  ;;  %v1957_v61 = vadd.f32 %v1928_v56, %v3839_v41 }
 0x231   : > { %v2872_v24 = vpop.f32.mrf.mxu0 }
 0x232   : > { %v2010_v21 = vpack.c.bf16 %v1999_v19, %v1998_v32  ;;  %v1982_v37 = vadd.f32 %v3854_v20, %v1957_v61 }
 0x233   : > { %v1931_v44 = vpop.f32.mrf.mxu0 }
 0x234   : > { %v1958_v12 = vadd.f32 %v1931_v44, %v3842_v4  ;;  %2907 = vmatmul.mubr.msk.bf16.gmra.mxu1 %vm380_vm1, %v2010_v21  ;;  %v2000_v3 = vmax.f32 %v1982_v37, 0.0 }
 0x235   : > { %v2873_v14 = vpop.f32.mrf.mxu0  ;;  %2910 = vmatprep.mubr.msk.bf16.mxu1 %vm2975_vm0, %v2974_v1 }
 0x236   : > { %v1983_v39 = vadd.f32 %v3854_v20, %v1958_v12 }
 0x237   : > { %v1936_v28 = vpop.f32.mrf.mxu0 }
 0x238   : > { %v2001_v36 = vmax.f32 %v1983_v39, 0.0  ;;  %v1959_v41 = vadd.f32 %v1936_v28, %v3845_v42  ;;  %v3920_v42 = vld [vmem:[%s3970_s4] ss:$0 sm:$0xff] }
 0x239   : > { %v2876_v17 = vpop.f32.mrf.mxu0 }
 0x23a   : > { %v2011_v57 = vpack.c.bf16 %v2001_v36, %v2000_v3  ;;  %v1984_v22 = vadd.f32 %v3854_v20, %v1959_v41 }
 0x23b   : > { %v1939_v62 = vpop.f32.mrf.mxu0 }
 0x23c   : > { %v1960_v4 = vadd.f32 %v1939_v62, %v3848_v45  ;;  %2911 = vmatmul.mubr.msk.bf16.gmra.mxu1 %vm380_vm1, %v2011_v57  ;;  %v2002_v55 = vmax.f32 %v1984_v22, 0.0 }
 0x23d   : > { %v2877_v54 = vpop.f32.mrf.mxu0  ;;  %2914 = vmatprep.mubr.msk.bf16.mxu1 %vm2975_vm0, %v2974_v1 }
 0x23e   : > { %v1985_v34 = vadd.f32 %v3854_v20, %v1960_v4 }
 0x240   : > { %v2003_v35 = vmax.f32 %v1985_v34, 0.0 }
 0x242   : > { %v2012_v2 = vpack.c.bf16 %v2003_v35, %v2002_v55 }
 0x244   : > { %2915 = vmatmul.mubr.msk.bf16.gmra.mxu1 %vm380_vm1, %v2012_v2 }
 0x2c4   : > { %v2097_v1 = vpop.f32.mrf.mxu1 }
 0x2c5   : > { %v2098_v45 = vadd.f32 %v3920_v42, %v2097_v1 }
 0x2c6   : > { %v2884_v20 = vpop.f32.mrf.mxu1 }
 0x2c7   : > { %2168 = vst [vmem:[%s3925_s25] sm:$0xff] %v2098_v45 }
 0x2c8   : > { %v2100_v11 = vpop.f32.mrf.mxu1 }
 0x2c9   : > { %v2101_v50 = vadd.f32 %v3920_v42, %v2100_v11 }
 0x2ca   : > { %v2885_v49 = vpop.f32.mrf.mxu1 }
 0x2cb   : > { %2169 = vst [vmem:[%s3925_s25 + $0x8] sm:$0xff] %v2101_v50 }
 0x2cc   : > { %v2105_v18 = vpop.f32.mrf.mxu1 }
 0x2cd   : > { %v2106_v26 = vadd.f32 %v3920_v42, %v2105_v18 }
 0x2ce   : > { %v2888_v46 = vpop.f32.mrf.mxu1 }
 0x2cf   : > { %2170 = vst [vmem:[%s3925_s25 + $0x10] sm:$0xff] %v2106_v26 }
 0x2d0   : > { %v2108_v6 = vpop.f32.mrf.mxu1 }
 0x2d1   : > { %v2109_v30 = vadd.f32 %v3920_v42, %v2108_v6 }
 0x2d2   : > { %v2889_v48 = vpop.f32.mrf.mxu1 }
 0x2d3   : > { %2171 = vst [vmem:[%s3925_s25 + $0x18] sm:$0xff] %v2109_v30 }
 0x2d4   : > { %v2113_v29 = vpop.f32.mrf.mxu1 }
 0x2d5   : > { %v2114_v23 = vadd.f32 %v3920_v42, %v2113_v29 }
 0x2d6   : > { %v2892_v27 = vpop.f32.mrf.mxu1 }
 0x2d7   : > { %2172 = vst [vmem:[%s3925_s25 + $0x20] sm:$0xff] %v2114_v23 }
 0x2d8   : > { %v2116_v0 = vpop.f32.mrf.mxu1 }
 0x2d9   : > { %v2117_v60 = vadd.f32 %v3920_v42, %v2116_v0 }
 0x2da   : > { %v2893_v8 = vpop.f32.mrf.mxu1 }
 0x2db   : > { %2173 = vst [vmem:[%s3925_s25 + $0x28] sm:$0xff] %v2117_v60 }
 0x2dc   : > { %v2121_v10 = vpop.f32.mrf.mxu1 }
 0x2dd   : > { %v2122_v31 = vadd.f32 %v3920_v42, %v2121_v10 }
 0x2de   : > { %v2896_v47 = vpop.f32.mrf.mxu1 }
 0x2df   : > { %2174 = vst [vmem:[%s3925_s25 + $0x30] sm:$0xff] %v2122_v31 }
 0x2e0   : > { %v2124_v7 = vpop.f32.mrf.mxu1 }
 0x2e1   : > { %v2125_v25 = vadd.f32 %v3920_v42, %v2124_v7 }
 0x2e2   : > { %v2897_v13 = vpop.f32.mrf.mxu1 }
 0x2e3   : > { %2175 = vst [vmem:[%s3925_s25 + $0x38] sm:$0xff] %v2125_v25 }
 0x2e4   : > { %v2129_v15 = vpop.f32.mrf.mxu1 }
 0x2e5   : > { %v2130_v40 = vadd.f32 %v3920_v42, %v2129_v15 }
 0x2e6   : > { %v2900_v16 = vpop.f32.mrf.mxu1 }
 0x2e7   : > { %2176 = vst [vmem:[%s3925_s25 + $0x40] sm:$0xff] %v2130_v40 }
 0x2e8   : > { %v2132_v63 = vpop.f32.mrf.mxu1 }
 0x2e9   : > { %v2133_v9 = vadd.f32 %v3920_v42, %v2132_v63 }
 0x2ea   : > { %v2901_v59 = vpop.f32.mrf.mxu1 }
 0x2eb   : > { %2177 = vst [vmem:[%s3925_s25 + $0x48] sm:$0xff] %v2133_v9 }
 0x2ec   : > { %v2137_v58 = vpop.f32.mrf.mxu1 }
 0x2ed   : > { %v2138_v52 = vadd.f32 %v3920_v42, %v2137_v58 }
 0x2ee   : > { %v2904_v53 = vpop.f32.mrf.mxu1 }
 0x2ef   : > { %2178 = vst [vmem:[%s3925_s25 + $0x50] sm:$0xff] %v2138_v52 }
 0x2f0   : > { %v2140_v51 = vpop.f32.mrf.mxu1 }
 0x2f1   : > { %v2141_v33 = vadd.f32 %v3920_v42, %v2140_v51 }
 0x2f2   : > { %v2905_v5 = vpop.f32.mrf.mxu1 }
 0x2f3   : > { %2179 = vst [vmem:[%s3925_s25 + $0x58] sm:$0xff] %v2141_v33 }
 0x2f4   : > { %v2145_v38 = vpop.f32.mrf.mxu1 }
 0x2f5   : > { %v2146_v43 = vadd.f32 %v3920_v42, %v2145_v38 }
 0x2f6   : > { %v2908_v56 = vpop.f32.mrf.mxu1 }
 0x2f7   : > { %2180 = vst [vmem:[%s3925_s25 + $0x60] sm:$0xff] %v2146_v43 }
 0x2f8   : > { %v2148_v32 = vpop.f32.mrf.mxu1 }
 0x2f9   : > { %v2149_v19 = vadd.f32 %v3920_v42, %v2148_v32 }
 0x2fa   : > { %v2909_v61 = vpop.f32.mrf.mxu1 }
 0x2fb   : > { %2181 = vst [vmem:[%s3925_s25 + $0x68] sm:$0xff] %v2149_v19 }
 0x2fc   : > { %v2153_v24 = vpop.f32.mrf.mxu1 }
 0x2fd   : > { %v2154_v21 = vadd.f32 %v3920_v42, %v2153_v24 }
 0x2fe   : > { %v2912_v44 = vpop.f32.mrf.mxu1 }
 0x2ff   : > { %2182 = vst [vmem:[%s3925_s25 + $0x70] sm:$0xff] %v2154_v21 }
 0x300   : > { %v2156_v37 = vpop.f32.mrf.mxu1 }
 0x301   : > { %v2157_v12 = vadd.f32 %v3920_v42, %v2156_v37 }
 0x302   : > { %v2913_v14 = vpop.f32.mrf.mxu1 }
 0x303   : > { %2183 = vst [vmem:[%s3925_s25 + $0x78] sm:$0xff] %v2157_v12 }
 0x304   : > { %v2161_v39 = vpop.f32.mrf.mxu1 }
 0x305   : > { %v2162_v28 = vadd.f32 %v3920_v42, %v2161_v39 }
 0x306   : > { %v2916_v3 = vpop.f32.mrf.mxu1 }
 0x307   : > { %2184 = vst [vmem:[%s3925_s25 + $0x80] sm:$0xff] %v2162_v28 }
 0x308   : > { %v2164_v36 = vpop.f32.mrf.mxu1 }
 0x309   : > { %v2165_v41 = vadd.f32 %v3920_v42, %v2164_v36 }
 0x30a   : > { %v2917_v17 = vpop.f32.mrf.mxu1 }
 0x30b   : > { %2185 = vst [vmem:[%s3925_s25 + $0x88] sm:$0xff] %v2165_v41 }
 0x30c PF: > { %s15_s18 = sadd.s32 1, %s2972_s18  }
 0x30d   : > { %p12_p4 = scmp.ge.s32.totalorder %s15_s18, 5  }
 0x30f   :  { %14 = sbr.rel (!%p12_p4) target bundleno = 1 (0x1), region = 78 }

</bundles_post_ra>
